<compile_context>
chip_gen: v6e
topology: v6e:2x2x1
jax: 0.10.0
libtpu: 0.0.40
codegen_flags: <defaults>
</compile_context>

<pallas_src>
import jax
import jax.numpy as jnp
from jax.experimental import pallas as pl
from jax.experimental.pallas import tpu as pltpu  # noqa: F401  (kept for TPU-specific extensions)

EPS = 1e-5


def _bn_kernel(x_ref, gamma_ref, beta_ref, o_ref):
    # x_ref: (N, C, HW) full block; gamma_ref / beta_ref: (1, C, 1)
    x = x_ref[...].astype(jnp.float32)
    n, _, hw = x.shape
    inv_r = 1.0 / float(n * hw)   # correct only because the spatial axis is un-tiled

    # Pass 1: per-channel mean (reduce over batch + spatial -> (1, C, 1)).
    mean = jnp.sum(x, axis=(0, 2), keepdims=True) * inv_r
    # Pass 2: centered data + biased variance (PyTorch normalizes with the
    # biased variance in training mode).
    xc = x - mean
    var = jnp.sum(xc * xc, axis=(0, 2), keepdims=True) * inv_r

    # Fold gamma into a single per-channel scale; output is 2 VPU ops/element.
    scale = gamma_ref[...].astype(jnp.float32) * jax.lax.rsqrt(var + EPS)
    shift = beta_ref[...].astype(jnp.float32)
    o_ref[...] = (xc * scale + shift).astype(o_ref.dtype)


def batchnorm2d(x_nchw, gamma, beta):
    """x_nchw: (N, C, H, W). gamma, beta: (C,). Training-mode batch-stat BN."""
    N, C, H, W = x_nchw.shape
    HW = H * W

    # Free reshapes only -- no transposes / extra HBM round trips.
    x3d = x_nchw.reshape(N, C, HW)
    gamma3d = gamma.reshape(1, C, 1)
    beta3d = beta.reshape(1, C, 1)

    out3d = pl.pallas_call(
        _bn_kernel,
        out_shape=jax.ShapeDtypeStruct((N, C, HW), x_nchw.dtype),
        grid=(1,),
        in_specs=[
            pl.BlockSpec((N, C, HW), lambda i: (0, 0, 0)),
            pl.BlockSpec((1, C, 1), lambda i: (0, 0, 0)),
            pl.BlockSpec((1, C, 1), lambda i: (0, 0, 0)),
        ],
        out_specs=pl.BlockSpec((N, C, HW), lambda i: (0, 0, 0)),
    )(x3d, gamma3d, beta3d)

    return out3d.reshape(N, C, H, W)


def _reference_bn(x_nchw, gamma, beta):
    mean = jnp.mean(x_nchw, axis=(0, 2, 3), keepdims=True)
    var = jnp.mean((x_nchw - mean) ** 2, axis=(0, 2, 3), keepdims=True)
    return (x_nchw - mean) * jax.lax.rsqrt(var + EPS) * gamma.reshape(1, -1, 1, 1) \
        + beta.reshape(1, -1, 1, 1)


if __name__ == "__main__":
    key = jax.random.PRNGKey(0)
    kx, kg, kb = jax.random.split(key, 3)

    N, C, H, W = 1, 544, 7, 7   # shapes implied by BatchNorm2d(544) and x321
    x = jax.random.normal(kx, (N, C, H, W), dtype=jnp.float32)
    # PyTorch init is gamma=1, beta=0; use non-trivial values to exercise the
    # affine path too.
    gamma = 1.0 + 0.1 * jax.random.normal(kg, (C,), dtype=jnp.float32)
    beta = 0.1 * jax.random.normal(kb, (C,), dtype=jnp.float32)

    out = jax.block_until_ready(batchnorm2d(x, gamma, beta))
    ref = _reference_bn(x, gamma, beta)

    assert out.shape == (N, C, H, W)
    assert jnp.allclose(out, ref, atol=1e-4, rtol=1e-4), float(jnp.max(jnp.abs(out - ref)))

    print("KERNEL_OK")
</pallas_src>

<mosaic_0001>
module attributes {stable_mosaic.version = 11 : i64} {
  func.func @_bn_kernel(%arg0: i32, %arg1: memref<1x544x49xf32, #tpu.memory_space<vmem>>, %arg2: memref<1x544x1xf32, #tpu.memory_space<vmem>>, %arg3: memref<1x544x1xf32, #tpu.memory_space<vmem>>, %arg4: memref<1x544x49xf32, #tpu.memory_space<vmem>>) attributes {dimension_semantics = [#tpu.dimension_semantics<arbitrary>], iteration_bounds = array<i64: 1>, scalar_prefetch = 0 : i64, scratch_operands = 0 : i64, tpu.core_type = #tpu.core_type<tc>, window_params = [{pipeline_mode = #tpu.pipeline_mode<synchronous>, transform_indices = @transform_0, window_bounds = array<i64: 1, 544, 49>}, {pipeline_mode = #tpu.pipeline_mode<synchronous>, transform_indices = @transform_1, window_bounds = array<i64: 1, 544, 1>}, {pipeline_mode = #tpu.pipeline_mode<synchronous>, transform_indices = @transform_2, window_bounds = array<i64: 1, 544, 1>}, {pipeline_mode = #tpu.pipeline_mode<synchronous>, transform_indices = @transform_3, window_bounds = array<i64: 1, 544, 49>}]} {
    %c0 = arith.constant 0 : index
    %c0_0 = arith.constant 0 : index
    %c0_1 = arith.constant 0 : index
    %0 = vector.load %arg1[%c0, %c0_0, %c0_1] : memref<1x544x49xf32, #tpu.memory_space<vmem>>, vector<1x544x49xf32>
    %cst = arith.constant dense<0.000000e+00> : vector<544xf32>
    %1 = vector.multi_reduction <add>, %0, %cst [0, 2] : vector<1x544x49xf32> to vector<544xf32>
    %2 = vector.shape_cast %1 : vector<544xf32> to vector<1x544x1xf32>
    %cst_2 = arith.constant 0.0204081628 : f32
    %3 = vector.broadcast %cst_2 : f32 to vector<1x544x1xf32>
    %4 = arith.mulf %2, %3 : vector<1x544x1xf32>
    %5 = vector.broadcast %4 : vector<1x544x1xf32> to vector<1x544x49xf32>
    %6 = arith.subf %0, %5 : vector<1x544x49xf32>
    %7 = arith.mulf %6, %6 : vector<1x544x49xf32>
    %cst_3 = arith.constant dense<0.000000e+00> : vector<544xf32>
    %8 = vector.multi_reduction <add>, %7, %cst_3 [0, 2] : vector<1x544x49xf32> to vector<544xf32>
    %9 = vector.shape_cast %8 : vector<544xf32> to vector<1x544x1xf32>
    %cst_4 = arith.constant 0.0204081628 : f32
    %10 = vector.broadcast %cst_4 : f32 to vector<1x544x1xf32>
    %11 = arith.mulf %9, %10 : vector<1x544x1xf32>
    %c0_5 = arith.constant 0 : index
    %c0_6 = arith.constant 0 : index
    %c0_7 = arith.constant 0 : index
    %12 = vector.load %arg2[%c0_5, %c0_6, %c0_7] : memref<1x544x1xf32, #tpu.memory_space<vmem>>, vector<1x544x1xf32>
    %cst_8 = arith.constant 9.99999974E-6 : f32
    %13 = vector.broadcast %cst_8 : f32 to vector<1x544x1xf32>
    %14 = arith.addf %11, %13 : vector<1x544x1xf32>
    %15 = math.rsqrt %14 : vector<1x544x1xf32>
    %16 = arith.mulf %12, %15 : vector<1x544x1xf32>
    %c0_9 = arith.constant 0 : index
    %c0_10 = arith.constant 0 : index
    %c0_11 = arith.constant 0 : index
    %17 = vector.load %arg3[%c0_9, %c0_10, %c0_11] : memref<1x544x1xf32, #tpu.memory_space<vmem>>, vector<1x544x1xf32>
    %18 = vector.broadcast %16 : vector<1x544x1xf32> to vector<1x544x49xf32>
    %19 = arith.mulf %6, %18 : vector<1x544x49xf32>
    %20 = vector.broadcast %17 : vector<1x544x1xf32> to vector<1x544x49xf32>
    %21 = arith.addf %19, %20 : vector<1x544x49xf32>
    %c0_12 = arith.constant 0 : index
    %c0_13 = arith.constant 0 : index
    %c0_14 = arith.constant 0 : index
    %22 = vector.load %arg4[%c0_12, %c0_13, %c0_14] : memref<1x544x49xf32, #tpu.memory_space<vmem>>, vector<1x544x49xf32>
    tpu.vector_store %arg4[%c0_12, %c0_13, %c0_14], %21 {strides = array<i32>} : memref<1x544x49xf32, #tpu.memory_space<vmem>>, vector<1x544x49xf32>,
    return
  }
  func.func @transform_0(%arg0: i32) -> (i32, i32, i32) {
    %c0_i32 = arith.constant 0 : i32
    %c0_i32_0 = arith.constant 0 : i32
    %c0_i32_1 = arith.constant 0 : i32
    %c0_i32_2 = arith.constant 0 : i32
    return %c0_i32, %c0_i32_0, %c0_i32_1 : i32, i32, i32
  }
  func.func @transform_1(%arg0: i32) -> (i32, i32, i32) {
    %c0_i32 = arith.constant 0 : i32
    %c0_i32_0 = arith.constant 0 : i32
    %c0_i32_1 = arith.constant 0 : i32
    %c0_i32_2 = arith.constant 0 : i32
    return %c0_i32, %c0_i32_0, %c0_i32_1 : i32, i32, i32
  }
  func.func @transform_2(%arg0: i32) -> (i32, i32, i32) {
    %c0_i32 = arith.constant 0 : i32
    %c0_i32_0 = arith.constant 0 : i32
    %c0_i32_1 = arith.constant 0 : i32
    %c0_i32_2 = arith.constant 0 : i32
    return %c0_i32, %c0_i32_0, %c0_i32_1 : i32, i32, i32
  }
  func.func @transform_3(%arg0: i32) -> (i32, i32, i32) {
    %c0_i32 = arith.constant 0 : i32
    %c0_i32_0 = arith.constant 0 : i32
    %c0_i32_1 = arith.constant 0 : i32
    %c0_i32_2 = arith.constant 0 : i32
    return %c0_i32, %c0_i32_0, %c0_i32_1 : i32, i32, i32
  }
}

</mosaic_0001>

<bundles_post_ra>
// kernel: tpu_custom_call.1
= control target key start
LH: loop header
LB: loop body
LE: loop exit
PB: predicated region body
PF: predicated region fallthrough
CT: control target
= control target key end

     0   :  { %vm82_vm0 = vcmask 400384   ;;  %s3987_s0 = inlined_call_operand.vmem [shape: f32[1,544,49], index: 0, kind: input, shape index: {}]   ;;  %s3988_s1 = inlined_call_operand.vmem [shape: f32[1,544,1], index: 1, kind: input, shape index: {}]   ;;  %s3989_s2 = inlined_call_operand.vmem [shape: f32[1,544,1], index: 2, kind: input, shape index: {}]   ;;  %s3990_s3 = inlined_call_operand.vmem [shape: f32[1,544,49], index: 3, kind: output, shape index: {}]  }
   0x1   :  { %v2154_v0 = vld [vmem:[%s3987_s0] sm:$0xff]  ;;  %v2159_v1 = vld [vmem:[%s3987_s0 + $0x10] sm:$0xff]  ;;  %v2164_v2 = vld [vmem:[%s3987_s0 + $0x8] sm:$0xff] }
   0x2   :  { %v83_v3 = vsel %vm82_vm0, %v2154_v0, 0.0  ;;  %v89_v4 = vsel %vm82_vm0, %v2159_v1, 0.0  ;;  %v2173_v5 = vld [vmem:[%s3987_s0 + $0x18] sm:$0xff]  ;;  %v86_v6 = vsel %vm82_vm0, %v2164_v2, 0.0  ;;  %v2182_v8 = vld [vmem:[%s3987_s0 + $0x28] sm:$0xff]  ;;  %v2187_v9 = vld [vmem:[%s3987_s0 + $0x20] sm:$0xff] }
   0x3   :  { %84 = vadd.xlane.f32.xlu0 %v83_v3  ;;  %90 = vadd.xlane.f32.xlu1 %v89_v4  ;;  %v92_v7 = vsel %vm82_vm0, %v2173_v5, 0.0  ;;  %v98_v10 = vsel %vm82_vm0, %v2182_v8, 0.0  ;;  %v95_v11 = vsel %vm82_vm0, %v2187_v9, 0.0  ;;  %v2196_v12 = vld [vmem:[%s3987_s0 + $0x38] sm:$0xff]  ;;  %v2201_v13 = vld [vmem:[%s3987_s0 + $0x30] sm:$0xff]  ;;  %v2210_v16 = vld [vmem:[%s3987_s0 + $0x48] sm:$0xff] }
   0x4   :  { %v104_v14 = vsel %vm82_vm0, %v2196_v12, 0.0  ;;  %v101_v15 = vsel %vm82_vm0, %v2201_v13, 0.0  ;;  %v2215_v17 = vld [vmem:[%s3987_s0 + $0x40] sm:$0xff]  ;;  %v110_v18 = vsel %vm82_vm0, %v2210_v16, 0.0  ;;  %v2224_v20 = vld [vmem:[%s3987_s0 + $0x58] sm:$0xff]  ;;  %v2229_v21 = vld [vmem:[%s3987_s0 + $0x50] sm:$0xff] }
   0x5   :  { %v107_v19 = vsel %vm82_vm0, %v2215_v17, 0.0  ;;  %v116_v22 = vsel %vm82_vm0, %v2224_v20, 0.0  ;;  %v113_v23 = vsel %vm82_vm0, %v2229_v21, 0.0  ;;  %v2238_v24 = vld [vmem:[%s3987_s0 + $0x68] sm:$0xff]  ;;  %v2243_v25 = vld [vmem:[%s3987_s0 + $0x60] sm:$0xff]  ;;  %v2252_v28 = vld [vmem:[%s3987_s0 + $0x78] sm:$0xff] }
   0x6   :  { %v122_v26 = vsel %vm82_vm0, %v2238_v24, 0.0  ;;  %v119_v27 = vsel %vm82_vm0, %v2243_v25, 0.0  ;;  %v2257_v29 = vld [vmem:[%s3987_s0 + $0x70] sm:$0xff]  ;;  %v128_v30 = vsel %vm82_vm0, %v2252_v28, 0.0  ;;  %v2266_v32 = vld [vmem:[%s3987_s0 + $0x88] sm:$0xff]  ;;  %v2271_v33 = vld [vmem:[%s3987_s0 + $0x80] sm:$0xff] }
   0x7   :  { %87 = vadd.xlane.f32.xlu0 %v86_v6  ;;  %93 = vadd.xlane.f32.xlu1 %v92_v7  ;;  %v125_v31 = vsel %vm82_vm0, %v2257_v29, 0.0  ;;  %v134_v34 = vsel %vm82_vm0, %v2266_v32, 0.0  ;;  %v131_v35 = vsel %vm82_vm0, %v2271_v33, 0.0  ;;  %v2280_v36 = vld [vmem:[%s3987_s0 + $0x98] sm:$0xff]  ;;  %v2285_v37 = vld [vmem:[%s3987_s0 + $0x90] sm:$0xff]  ;;  %v2294_v40 = vld [vmem:[%s3987_s0 + $0xa8] sm:$0xff] }
   0x8   :  { %v140_v38 = vsel %vm82_vm0, %v2280_v36, 0.0  ;;  %v137_v39 = vsel %vm82_vm0, %v2285_v37, 0.0  ;;  %v2299_v41 = vld [vmem:[%s3987_s0 + $0xa0] sm:$0xff]  ;;  %v146_v42 = vsel %vm82_vm0, %v2294_v40, 0.0  ;;  %v2308_v44 = vld [vmem:[%s3987_s0 + $0xb8] sm:$0xff]  ;;  %v2313_v45 = vld [vmem:[%s3987_s0 + $0xb0] sm:$0xff] }
   0x9   :  { %v143_v43 = vsel %vm82_vm0, %v2299_v41, 0.0  ;;  %v152_v46 = vsel %vm82_vm0, %v2308_v44, 0.0  ;;  %v149_v47 = vsel %vm82_vm0, %v2313_v45, 0.0  ;;  %v2322_v48 = vld [vmem:[%s3987_s0 + $0xc8] sm:$0xff]  ;;  %v2327_v49 = vld [vmem:[%s3987_s0 + $0xc0] sm:$0xff]  ;;  %v2336_v52 = vld [vmem:[%s3987_s0 + $0xd8] sm:$0xff] }
   0xa   :  { %v158_v50 = vsel %vm82_vm0, %v2322_v48, 0.0  ;;  %v155_v51 = vsel %vm82_vm0, %v2327_v49, 0.0  ;;  %v2341_v53 = vld [vmem:[%s3987_s0 + $0xd0] sm:$0xff]  ;;  %v164_v54 = vsel %vm82_vm0, %v2336_v52, 0.0  ;;  %v2350_v56 = vld [vmem:[%s3987_s0 + $0xe8] sm:$0xff]  ;;  %v2355_v57 = vld [vmem:[%s3987_s0 + $0xe0] sm:$0xff] }
   0xb   :  { %99 = vadd.xlane.f32.xlu1 %v98_v10  ;;  %96 = vadd.xlane.f32.xlu0 %v95_v11  ;;  %v161_v55 = vsel %vm82_vm0, %v2341_v53, 0.0  ;;  %v170_v58 = vsel %vm82_vm0, %v2350_v56, 0.0  ;;  %v167_v59 = vsel %vm82_vm0, %v2355_v57, 0.0  ;;  %v2364_v60 = vld [vmem:[%s3987_s0 + $0xf8] sm:$0xff]  ;;  %v2369_v61 = vld [vmem:[%s3987_s0 + $0xf0] sm:$0xff]  ;;  %v2378_v3 = vld [vmem:[%s3987_s0 + $0x108] sm:$0xff] }
   0xc   :  { %v176_v62 = vsel %vm82_vm0, %v2364_v60, 0.0  ;;  %v173_v63 = vsel %vm82_vm0, %v2369_v61, 0.0  ;;  %v2383_v4 = vld [vmem:[%s3987_s0 + $0x100] sm:$0xff]  ;;  %v182_v6 = vsel %vm82_vm0, %v2378_v3, 0.0  ;;  %v2392_v10 = vld [vmem:[%s3987_s0 + $0x118] sm:$0xff]  ;;  %v2397_v11 = vld [vmem:[%s3987_s0 + $0x110] sm:$0xff] }
   0xd   :  { %v179_v7 = vsel %vm82_vm0, %v2383_v4, 0.0 }
   0xf   :  { %105 = vadd.xlane.f32.xlu1 %v104_v14  ;;  %102 = vadd.xlane.f32.xlu0 %v101_v15  ;;  %v188_v14 = vsel %vm82_vm0, %v2392_v10, 0.0  ;;  %v185_v15 = vsel %vm82_vm0, %v2397_v11, 0.0 }
  0x13   :  { %111 = vadd.xlane.f32.xlu1 %v110_v18  ;;  %108 = vadd.xlane.f32.xlu0 %v107_v19  ;;  %v2406_v18 = vld [vmem:[%s3987_s0 + $0x128] sm:$0xff]  ;;  %v2411_v19 = vld [vmem:[%s3987_s0 + $0x120] sm:$0xff] }
  0x17   :  { %117 = vadd.xlane.f32.xlu1 %v116_v22  ;;  %114 = vadd.xlane.f32.xlu0 %v113_v23  ;;  %v194_v22 = vsel %vm82_vm0, %v2406_v18, 0.0  ;;  %v191_v23 = vsel %vm82_vm0, %v2411_v19, 0.0 }
  0x1b   :  { %123 = vadd.xlane.f32.xlu1 %v122_v26  ;;  %120 = vadd.xlane.f32.xlu0 %v119_v27  ;;  %v2420_v26 = vld [vmem:[%s3987_s0 + $0x138] sm:$0xff]  ;;  %v2425_v27 = vld [vmem:[%s3987_s0 + $0x130] sm:$0xff] }
  0x1f   :  { %129 = vadd.xlane.f32.xlu1 %v128_v30  ;;  %126 = vadd.xlane.f32.xlu0 %v125_v31  ;;  %v200_v30 = vsel %vm82_vm0, %v2420_v26, 0.0  ;;  %v197_v31 = vsel %vm82_vm0, %v2425_v27, 0.0 }
  0x23   :  { %135 = vadd.xlane.f32.xlu1 %v134_v34  ;;  %132 = vadd.xlane.f32.xlu0 %v131_v35  ;;  %v2434_v34 = vld [vmem:[%s3987_s0 + $0x148] sm:$0xff]  ;;  %v2439_v35 = vld [vmem:[%s3987_s0 + $0x140] sm:$0xff] }
  0x27   :  { %141 = vadd.xlane.f32.xlu1 %v140_v38  ;;  %138 = vadd.xlane.f32.xlu0 %v137_v39  ;;  %v206_v38 = vsel %vm82_vm0, %v2434_v34, 0.0  ;;  %v203_v39 = vsel %vm82_vm0, %v2439_v35, 0.0 }
  0x2b   :  { %147 = vadd.xlane.f32.xlu1 %v146_v42  ;;  %144 = vadd.xlane.f32.xlu0 %v143_v43  ;;  %v2448_v42 = vld [vmem:[%s3987_s0 + $0x158] sm:$0xff]  ;;  %v2453_v43 = vld [vmem:[%s3987_s0 + $0x150] sm:$0xff] }
  0x2f   :  { %153 = vadd.xlane.f32.xlu1 %v152_v46  ;;  %150 = vadd.xlane.f32.xlu0 %v149_v47  ;;  %v212_v46 = vsel %vm82_vm0, %v2448_v42, 0.0  ;;  %v209_v47 = vsel %vm82_vm0, %v2453_v43, 0.0 }
  0x33   :  { %159 = vadd.xlane.f32.xlu1 %v158_v50  ;;  %156 = vadd.xlane.f32.xlu0 %v155_v51  ;;  %v2462_v50 = vld [vmem:[%s3987_s0 + $0x168] sm:$0xff]  ;;  %v2467_v51 = vld [vmem:[%s3987_s0 + $0x160] sm:$0xff] }
  0x37   :  { %165 = vadd.xlane.f32.xlu1 %v164_v54  ;;  %162 = vadd.xlane.f32.xlu0 %v161_v55  ;;  %v218_v54 = vsel %vm82_vm0, %v2462_v50, 0.0  ;;  %v215_v55 = vsel %vm82_vm0, %v2467_v51, 0.0 }
  0x3b   :  { %171 = vadd.xlane.f32.xlu1 %v170_v58  ;;  %168 = vadd.xlane.f32.xlu0 %v167_v59  ;;  %v2476_v58 = vld [vmem:[%s3987_s0 + $0x178] sm:$0xff]  ;;  %v2481_v59 = vld [vmem:[%s3987_s0 + $0x170] sm:$0xff] }
  0x3f   :  { %177 = vadd.xlane.f32.xlu1 %v176_v62  ;;  %174 = vadd.xlane.f32.xlu0 %v173_v63  ;;  %v224_v62 = vsel %vm82_vm0, %v2476_v58, 0.0  ;;  %v221_v63 = vsel %vm82_vm0, %v2481_v59, 0.0 }
  0x43   :  { %183 = vadd.xlane.f32.xlu1 %v182_v6  ;;  %180 = vadd.xlane.f32.xlu0 %v179_v7  ;;  %v2490_v6 = vld [vmem:[%s3987_s0 + $0x188] sm:$0xff]  ;;  %v2495_v7 = vld [vmem:[%s3987_s0 + $0x180] sm:$0xff] }
  0x47   :  { %189 = vadd.xlane.f32.xlu1 %v188_v14  ;;  %186 = vadd.xlane.f32.xlu0 %v185_v15  ;;  %v230_v14 = vsel %vm82_vm0, %v2490_v6, 0.0  ;;  %v227_v15 = vsel %vm82_vm0, %v2495_v7, 0.0 }
  0x4b   :  { %195 = vadd.xlane.f32.xlu1 %v194_v22  ;;  %192 = vadd.xlane.f32.xlu0 %v191_v23  ;;  %v2504_v22 = vld [vmem:[%s3987_s0 + $0x198] sm:$0xff]  ;;  %v2509_v23 = vld [vmem:[%s3987_s0 + $0x190] sm:$0xff] }
  0x4c   :  { %4050 = vst [vmem:[#allocation2_spill] sm:$0xff] %v2504_v22  ;;  %4051 = vst [vmem:[#allocation3_spill] sm:$0xff] %v2509_v23 }
  0x4f   :  { %201 = vadd.xlane.f32.xlu1 %v200_v30  ;;  %198 = vadd.xlane.f32.xlu0 %v197_v31  ;;  %v236_v30 = vsel %vm82_vm0, %v2504_v22, 0.0  ;;  %v233_v31 = vsel %vm82_vm0, %v2509_v23, 0.0 }
  0x53   :  { %207 = vadd.xlane.f32.xlu1 %v206_v38  ;;  %204 = vadd.xlane.f32.xlu0 %v203_v39  ;;  %v2518_v38 = vld [vmem:[%s3987_s0 + $0x1a8] sm:$0xff]  ;;  %v2523_v39 = vld [vmem:[%s3987_s0 + $0x1a0] sm:$0xff] }
  0x54   :  { %4052 = vst [vmem:[#allocation4_spill] sm:$0xff] %v2518_v38  ;;  %4053 = vst [vmem:[#allocation5_spill] sm:$0xff] %v2523_v39 }
  0x57   :  { %213 = vadd.xlane.f32.xlu1 %v212_v46  ;;  %210 = vadd.xlane.f32.xlu0 %v209_v47  ;;  %v242_v46 = vsel %vm82_vm0, %v2518_v38, 0.0  ;;  %v239_v47 = vsel %vm82_vm0, %v2523_v39, 0.0 }
  0x5b   :  { %219 = vadd.xlane.f32.xlu1 %v218_v54  ;;  %216 = vadd.xlane.f32.xlu0 %v215_v55  ;;  %v2532_v54 = vld [vmem:[%s3987_s0 + $0x1b8] sm:$0xff]  ;;  %v2537_v55 = vld [vmem:[%s3987_s0 + $0x1b0] sm:$0xff] }
  0x5c   :  { %4054 = vst [vmem:[#allocation6_spill] sm:$0xff] %v2532_v54  ;;  %4055 = vst [vmem:[#allocation7_spill] sm:$0xff] %v2537_v55 }
  0x5f   :  { %225 = vadd.xlane.f32.xlu1 %v224_v62  ;;  %222 = vadd.xlane.f32.xlu0 %v221_v63  ;;  %v248_v62 = vsel %vm82_vm0, %v2532_v54, 0.0  ;;  %v245_v63 = vsel %vm82_vm0, %v2537_v55, 0.0 }
  0x63   :  { %231 = vadd.xlane.f32.xlu1 %v230_v14  ;;  %228 = vadd.xlane.f32.xlu0 %v227_v15  ;;  %v2546_v14 = vld [vmem:[%s3987_s0 + $0x1c8] sm:$0xff]  ;;  %v2551_v15 = vld [vmem:[%s3987_s0 + $0x1c0] sm:$0xff] }
  0x64   :  { %4056 = vst [vmem:[#allocation8_spill] sm:$0xff] %v2546_v14  ;;  %4057 = vst [vmem:[#allocation9_spill] sm:$0xff] %v2551_v15 }
  0x67   :  { %237 = vadd.xlane.f32.xlu1 %v236_v30  ;;  %234 = vadd.xlane.f32.xlu0 %v233_v31  ;;  %v254_v30 = vsel %vm82_vm0, %v2546_v14, 0.0  ;;  %v251_v31 = vsel %vm82_vm0, %v2551_v15, 0.0  ;;  %v2574_v15 = vld [vmem:[%s3987_s0 + $0x1e8] sm:$0xff]  ;;  %v2579_v14 = vld [vmem:[%s3987_s0 + $0x1e0] sm:$0xff] }
  0x68   :  { %4060 = vst [vmem:[#allocation12_spill] sm:$0xff] %v2574_v15  ;;  %4061 = vst [vmem:[#allocation13_spill] sm:$0xff] %v2579_v14 }
  0x6b   :  { %243 = vadd.xlane.f32.xlu1 %v242_v46  ;;  %240 = vadd.xlane.f32.xlu0 %v239_v47  ;;  %v2560_v46 = vld [vmem:[%s3987_s0 + $0x1d8] sm:$0xff]  ;;  %v2565_v47 = vld [vmem:[%s3987_s0 + $0x1d0] sm:$0xff] }
  0x6c   :  { %4058 = vst [vmem:[#allocation10_spill] sm:$0xff] %v2560_v46  ;;  %4059 = vst [vmem:[#allocation11_spill] sm:$0xff] %v2565_v47 }
  0x6f   :  { %249 = vadd.xlane.f32.xlu1 %v248_v62  ;;  %246 = vadd.xlane.f32.xlu0 %v245_v63  ;;  %v260_v62 = vsel %vm82_vm0, %v2560_v46, 0.0  ;;  %v257_v63 = vsel %vm82_vm0, %v2565_v47, 0.0  ;;  %v2588_v47 = vld [vmem:[%s3987_s0 + $0x1f8] sm:$0xff]  ;;  %v2593_v46 = vld [vmem:[%s3987_s0 + $0x1f0] sm:$0xff] }
  0x70   :  { %4062 = vst [vmem:[#allocation14_spill] sm:$0xff] %v2588_v47  ;;  %4063 = vst [vmem:[#allocation15_spill] sm:$0xff] %v2593_v46 }
  0x73   :  { %255 = vadd.xlane.f32.xlu1 %v254_v30  ;;  %252 = vadd.xlane.f32.xlu0 %v251_v31  ;;  %v266_v30 = vsel %vm82_vm0, %v2574_v15, 0.0  ;;  %v263_v31 = vsel %vm82_vm0, %v2579_v14, 0.0  ;;  %v2602_v14 = vld [vmem:[%s3987_s0 + $0x208] sm:$0xff]  ;;  %v2607_v15 = vld [vmem:[%s3987_s0 + $0x200] sm:$0xff] }
  0x74   :  { %4064 = vst [vmem:[#allocation16_spill] sm:$0xff] %v2602_v14  ;;  %4065 = vst [vmem:[#allocation17_spill] sm:$0xff] %v2607_v15 }
  0x77   :  { %261 = vadd.xlane.f32.xlu1 %v260_v62  ;;  %258 = vadd.xlane.f32.xlu0 %v257_v63  ;;  %v272_v62 = vsel %vm82_vm0, %v2588_v47, 0.0  ;;  %v269_v63 = vsel %vm82_vm0, %v2593_v46, 0.0  ;;  %v2616_v46 = vld [vmem:[%s3987_s0 + $0x218] sm:$0xff]  ;;  %v2621_v47 = vld [vmem:[%s3987_s0 + $0x210] sm:$0xff] }
  0x78   :  { %4066 = vst [vmem:[#allocation18_spill] sm:$0xff] %v2616_v46 }
  0x7b   :  { %267 = vadd.xlane.f32.xlu1 %v266_v30  ;;  %264 = vadd.xlane.f32.xlu0 %v263_v31  ;;  %v278_v30 = vsel %vm82_vm0, %v2602_v14, 0.0  ;;  %v275_v31 = vsel %vm82_vm0, %v2607_v15, 0.0 }
  0x7f   :  { %273 = vadd.xlane.f32.xlu1 %v272_v62  ;;  %270 = vadd.xlane.f32.xlu0 %v269_v63  ;;  %v284_v62 = vsel %vm82_vm0, %v2616_v46, 0.0  ;;  %v281_v63 = vsel %vm82_vm0, %v2621_v47, 0.0 }
  0x83   :  { %279 = vadd.xlane.f32.xlu1 %v278_v30  ;;  %276 = vadd.xlane.f32.xlu0 %v275_v31 }
  0x87   :  { %285 = vadd.xlane.f32.xlu1 %v284_v62  ;;  %282 = vadd.xlane.f32.xlu0 %v281_v63 }
  0x8c   :  { %v85_v15 = vpop.xlane.xlu0 %84  ;;  %v91_v14 = vpop.xlane.xlu1 %90 }
  0x8d   :  { %v287_v55 = vmul.f32 0.020408163, %v85_v15  ;;  %v289_v54 = vmul.f32 0.020408163, %v91_v14 }
  0x8f   :  { %v2628_v39 = vsub.f32 %v2154_v0, %v287_v55  ;;  %v2631_v38 = vsub.f32 %v2159_v1, %v289_v54 }
  0x90   :  { %v88_v30 = vpop.xlane.xlu0 %87  ;;  %v94_v31 = vpop.xlane.xlu1 %93 }
  0x91   :  { %4067 = vst [vmem:[#allocation19_spill] sm:$0xff] %v2631_v38  ;;  %v288_v23 = vmul.f32 0.020408163, %v88_v30  ;;  %v290_v22 = vmul.f32 0.020408163, %v94_v31  ;;  %v423_v46 = vmul.f32 %v2628_v39, %v2628_v39  ;;  %v425_v62 = vmul.f32 %v2631_v38, %v2631_v38 }
  0x93   :  { %v2638_v63 = vsub.f32 %v2164_v2, %v288_v23  ;;  %v2641_v14 = vsub.f32 %v2173_v5, %v290_v22  ;;  %v491_v0 = vsel %vm82_vm0, %v423_v46, 0.0  ;;  %v497_v55 = vsel %vm82_vm0, %v425_v62, 0.0 }
  0x94   :  { %492 = vadd.xlane.f32.xlu0 %v491_v0  ;;  %v100_v1 = vpop.xlane.xlu1 %99  ;;  %v97_v54 = vpop.xlane.xlu0 %96 }
  0x95   :  { %v292_v15 = vmul.f32 0.020408163, %v100_v1  ;;  %v424_v30 = vmul.f32 %v2638_v63, %v2638_v63  ;;  %v291_v31 = vmul.f32 0.020408163, %v97_v54  ;;  %v426_v38 = vmul.f32 %v2641_v14, %v2641_v14 }
  0x97   :  { %v2650_v2 = vsub.f32 %v2182_v8, %v292_v15  ;;  %v494_v5 = vsel %vm82_vm0, %v424_v30, 0.0  ;;  %v2654_v22 = vsub.f32 %v2187_v9, %v291_v31  ;;  %v500_v46 = vsel %vm82_vm0, %v426_v38, 0.0 }
  0x98   :  { %495 = vadd.xlane.f32.xlu1 %v494_v5  ;;  %v106_v23 = vpop.xlane.xlu1 %105  ;;  %498 = vadd.xlane.f32.xlu0 %v497_v55  ;;  %v103_v62 = vpop.xlane.xlu0 %102 }
  0x99   :  { %v294_v0 = vmul.f32 0.020408163, %v106_v23  ;;  %v293_v1 = vmul.f32 0.020408163, %v103_v62  ;;  %v428_v54 = vmul.f32 %v2650_v2, %v2650_v2  ;;  %v427_v8 = vmul.f32 %v2654_v22, %v2654_v22 }
  0x9b   :  { %v2662_v15 = vsub.f32 %v2196_v12, %v294_v0  ;;  %v2665_v9 = vsub.f32 %v2201_v13, %v293_v1  ;;  %v503_v30 = vsel %vm82_vm0, %v427_v8, 0.0  ;;  %v506_v38 = vsel %vm82_vm0, %v428_v54, 0.0 }
  0x9c   :  { %501 = vadd.xlane.f32.xlu1 %v500_v46  ;;  %v112_v55 = vpop.xlane.xlu1 %111  ;;  %504 = vadd.xlane.f32.xlu0 %v503_v30  ;;  %v109_v31 = vpop.xlane.xlu0 %108 }
  0x9d   :  { %v296_v5 = vmul.f32 0.020408163, %v112_v55  ;;  %v295_v23 = vmul.f32 0.020408163, %v109_v31  ;;  %v430_v62 = vmul.f32 %v2662_v15, %v2662_v15  ;;  %v429_v12 = vmul.f32 %v2665_v9, %v2665_v9 }
  0x9f   :  { %v2674_v0 = vsub.f32 %v2210_v16, %v296_v5  ;;  %v2677_v13 = vsub.f32 %v2215_v17, %v295_v23  ;;  %v509_v46 = vsel %vm82_vm0, %v429_v12, 0.0  ;;  %v512_v54 = vsel %vm82_vm0, %v430_v62, 0.0 }
  0xa0   :  { %507 = vadd.xlane.f32.xlu1 %v506_v38  ;;  %v118_v1 = vpop.xlane.xlu1 %117  ;;  %510 = vadd.xlane.f32.xlu0 %v509_v46  ;;  %v115_v8 = vpop.xlane.xlu0 %114 }
  0xa1   :  { %v298_v30 = vmul.f32 0.020408163, %v118_v1  ;;  %v297_v55 = vmul.f32 0.020408163, %v115_v8  ;;  %v432_v31 = vmul.f32 %v2674_v0, %v2674_v0  ;;  %v431_v16 = vmul.f32 %v2677_v13, %v2677_v13 }
  0xa3   :  { %v2686_v5 = vsub.f32 %v2224_v20, %v298_v30  ;;  %v2689_v17 = vsub.f32 %v2229_v21, %v297_v55  ;;  %v515_v38 = vsel %vm82_vm0, %v431_v16, 0.0  ;;  %v518_v62 = vsel %vm82_vm0, %v432_v31, 0.0 }
  0xa4   :  { %513 = vadd.xlane.f32.xlu1 %v512_v54  ;;  %v124_v23 = vpop.xlane.xlu1 %123  ;;  %516 = vadd.xlane.f32.xlu0 %v515_v38  ;;  %v121_v12 = vpop.xlane.xlu0 %120 }
  0xa5   :  { %v300_v46 = vmul.f32 0.020408163, %v124_v23  ;;  %v299_v1 = vmul.f32 0.020408163, %v121_v12  ;;  %v434_v8 = vmul.f32 %v2686_v5, %v2686_v5  ;;  %v433_v20 = vmul.f32 %v2689_v17, %v2689_v17 }
  0xa7   :  { %v2698_v30 = vsub.f32 %v2238_v24, %v300_v46  ;;  %v2701_v21 = vsub.f32 %v2243_v25, %v299_v1  ;;  %v521_v54 = vsel %vm82_vm0, %v433_v20, 0.0  ;;  %v524_v31 = vsel %vm82_vm0, %v434_v8, 0.0 }
  0xa8   :  { %519 = vadd.xlane.f32.xlu1 %v518_v62  ;;  %v130_v55 = vpop.xlane.xlu1 %129  ;;  %522 = vadd.xlane.f32.xlu0 %v521_v54  ;;  %v127_v16 = vpop.xlane.xlu0 %126 }
  0xa9   :  { %v302_v38 = vmul.f32 0.020408163, %v130_v55  ;;  %v301_v23 = vmul.f32 0.020408163, %v127_v16  ;;  %v436_v12 = vmul.f32 %v2698_v30, %v2698_v30  ;;  %v435_v24 = vmul.f32 %v2701_v21, %v2701_v21 }
  0xab   :  { %v2710_v46 = vsub.f32 %v2252_v28, %v302_v38  ;;  %v2713_v25 = vsub.f32 %v2257_v29, %v301_v23  ;;  %v527_v62 = vsel %vm82_vm0, %v435_v24, 0.0  ;;  %v530_v8 = vsel %vm82_vm0, %v436_v12, 0.0 }
  0xac   :  { %525 = vadd.xlane.f32.xlu1 %v524_v31  ;;  %v136_v1 = vpop.xlane.xlu1 %135  ;;  %528 = vadd.xlane.f32.xlu0 %v527_v62  ;;  %v133_v20 = vpop.xlane.xlu0 %132 }
  0xad   :  { %v304_v54 = vmul.f32 0.020408163, %v136_v1  ;;  %v303_v55 = vmul.f32 0.020408163, %v133_v20  ;;  %v438_v16 = vmul.f32 %v2710_v46, %v2710_v46  ;;  %v437_v28 = vmul.f32 %v2713_v25, %v2713_v25 }
  0xaf   :  { %v2722_v38 = vsub.f32 %v2266_v32, %v304_v54  ;;  %v2725_v29 = vsub.f32 %v2271_v33, %v303_v55  ;;  %v533_v31 = vsel %vm82_vm0, %v437_v28, 0.0  ;;  %v536_v12 = vsel %vm82_vm0, %v438_v16, 0.0 }
  0xb0   :  { %531 = vadd.xlane.f32.xlu1 %v530_v8  ;;  %v142_v23 = vpop.xlane.xlu1 %141  ;;  %534 = vadd.xlane.f32.xlu0 %v533_v31  ;;  %v139_v24 = vpop.xlane.xlu0 %138  ;;  %v2130_v54 = vmov 0  }
  0xb1   :  { %4068 = vst [vmem:[#allocation20_spill] sm:$0xff] %v2725_v29  ;;  %v306_v62 = vmul.f32 0.020408163, %v142_v23  ;;  %v305_v1 = vmul.f32 0.020408163, %v139_v24  ;;  %v440_v20 = vmul.f32 %v2722_v38, %v2722_v38  ;;  %v439_v32 = vmul.f32 %v2725_v29, %v2725_v29  ;;  %1992 = vset.pattern.permute.xlu0 %v2130_v54  ;;  %1993 = vset.pattern.permute.xlu1 %v2130_v54 }
  0xb3   :  { %v2734_v33 = vsub.f32 %v2280_v36, %v306_v62  ;;  %v2737_v8 = vsub.f32 %v2285_v37, %v305_v1  ;;  %v539_v55 = vsel %vm82_vm0, %v439_v32, 0.0  ;;  %v542_v28 = vsel %vm82_vm0, %v440_v20, 0.0 }
  0xb4   :  { %537 = vadd.xlane.f32.xlu1 %v536_v12  ;;  %v148_v16 = vpop.xlane.xlu1 %147  ;;  %540 = vadd.xlane.f32.xlu0 %v539_v55  ;;  %v145_v31 = vpop.xlane.xlu0 %144 }
  0xb5   :  { %v308_v23 = vmul.f32 0.020408163, %v148_v16  ;;  %v307_v24 = vmul.f32 0.020408163, %v145_v31  ;;  %v442_v29 = vmul.f32 %v2734_v33, %v2734_v33  ;;  %v441_v36 = vmul.f32 %v2737_v8, %v2737_v8 }
  0xb7   :  { %v2746_v62 = vsub.f32 %v2294_v40, %v308_v23  ;;  %v2749_v37 = vsub.f32 %v2299_v41, %v307_v24  ;;  %v545_v12 = vsel %vm82_vm0, %v441_v36, 0.0  ;;  %v548_v20 = vsel %vm82_vm0, %v442_v29, 0.0 }
  0xb8   :  { %543 = vadd.xlane.f32.xlu1 %v542_v28  ;;  %v154_v1 = vpop.xlane.xlu1 %153  ;;  %546 = vadd.xlane.f32.xlu0 %v545_v12  ;;  %v151_v32 = vpop.xlane.xlu0 %150 }
  0xb9   :  { %v310_v54 = vmul.f32 0.020408163, %v154_v1  ;;  %v309_v55 = vmul.f32 0.020408163, %v151_v32  ;;  %v444_v16 = vmul.f32 %v2746_v62, %v2746_v62  ;;  %v443_v40 = vmul.f32 %v2749_v37, %v2749_v37 }
  0xbb   :  { %v2758_v31 = vsub.f32 %v2308_v44, %v310_v54  ;;  %v2761_v41 = vsub.f32 %v2313_v45, %v309_v55  ;;  %v551_v28 = vsel %vm82_vm0, %v443_v40, 0.0  ;;  %v554_v23 = vsel %vm82_vm0, %v444_v16, 0.0 }
  0xbc   :  { %549 = vadd.xlane.f32.xlu1 %v548_v20  ;;  %v160_v29 = vpop.xlane.xlu1 %159  ;;  %552 = vadd.xlane.f32.xlu0 %v551_v28  ;;  %v157_v24 = vpop.xlane.xlu0 %156 }
  0xbd   :  { %v312_v36 = vmul.f32 0.020408163, %v160_v29  ;;  %v311_v12 = vmul.f32 0.020408163, %v157_v24  ;;  %v446_v1 = vmul.f32 %v2758_v31, %v2758_v31  ;;  %v445_v44 = vmul.f32 %v2761_v41, %v2761_v41 }
  0xbf   :  { %v2770_v32 = vsub.f32 %v2322_v48, %v312_v36  ;;  %v2773_v45 = vsub.f32 %v2327_v49, %v311_v12  ;;  %v557_v20 = vsel %vm82_vm0, %v445_v44, 0.0  ;;  %v560_v55 = vsel %vm82_vm0, %v446_v1, 0.0 }
  0xc0   :  { %555 = vadd.xlane.f32.xlu1 %v554_v23  ;;  %v166_v54 = vpop.xlane.xlu1 %165  ;;  %558 = vadd.xlane.f32.xlu0 %v557_v20  ;;  %v163_v16 = vpop.xlane.xlu0 %162 }
  0xc1   :  { %v314_v40 = vmul.f32 0.020408163, %v166_v54  ;;  %v313_v28 = vmul.f32 0.020408163, %v163_v16  ;;  %v448_v29 = vmul.f32 %v2770_v32, %v2770_v32  ;;  %v447_v48 = vmul.f32 %v2773_v45, %v2773_v45 }
  0xc3   :  { %v2782_v24 = vsub.f32 %v2336_v52, %v314_v40  ;;  %v2785_v49 = vsub.f32 %v2341_v53, %v313_v28  ;;  %v563_v23 = vsel %vm82_vm0, %v447_v48, 0.0  ;;  %v566_v12 = vsel %vm82_vm0, %v448_v29, 0.0 }
  0xc4   :  { %561 = vadd.xlane.f32.xlu1 %v560_v55  ;;  %v172_v36 = vpop.xlane.xlu1 %171  ;;  %564 = vadd.xlane.f32.xlu0 %v563_v23  ;;  %v169_v1 = vpop.xlane.xlu0 %168 }
  0xc5   :  { %4069 = vst [vmem:[#allocation21_spill] sm:$0xff] %v2785_v49  ;;  %v316_v44 = vmul.f32 0.020408163, %v172_v36  ;;  %v315_v20 = vmul.f32 0.020408163, %v169_v1  ;;  %v450_v54 = vmul.f32 %v2782_v24, %v2782_v24  ;;  %v449_v52 = vmul.f32 %v2785_v49, %v2785_v49 }
  0xc7   :  { %v2794_v16 = vsub.f32 %v2350_v56, %v316_v44  ;;  %v2797_v53 = vsub.f32 %v2355_v57, %v315_v20  ;;  %v569_v55 = vsel %vm82_vm0, %v449_v52, 0.0  ;;  %v572_v28 = vsel %vm82_vm0, %v450_v54, 0.0 }
  0xc8   :  { %567 = vadd.xlane.f32.xlu1 %v566_v12  ;;  %v178_v40 = vpop.xlane.xlu1 %177  ;;  %570 = vadd.xlane.f32.xlu0 %v569_v55  ;;  %v175_v29 = vpop.xlane.xlu0 %174 }
  0xc9   :  { %4070 = vst [vmem:[#allocation22_spill] sm:$0xff] %v2797_v53  ;;  %v318_v48 = vmul.f32 0.020408163, %v178_v40  ;;  %v317_v23 = vmul.f32 0.020408163, %v175_v29  ;;  %v452_v36 = vmul.f32 %v2794_v16, %v2794_v16  ;;  %v451_v56 = vmul.f32 %v2797_v53, %v2797_v53 }
  0xcb   :  { %v2806_v1 = vsub.f32 %v2364_v60, %v318_v48  ;;  %v2809_v57 = vsub.f32 %v2369_v61, %v317_v23  ;;  %v575_v12 = vsel %vm82_vm0, %v451_v56, 0.0  ;;  %v578_v20 = vsel %vm82_vm0, %v452_v36, 0.0 }
  0xcc   :  { %573 = vadd.xlane.f32.xlu1 %v572_v28  ;;  %v184_v44 = vpop.xlane.xlu1 %183  ;;  %576 = vadd.xlane.f32.xlu0 %v575_v12  ;;  %v181_v54 = vpop.xlane.xlu0 %180 }
  0xcd   :  { %4071 = vst [vmem:[#allocation23_spill] sm:$0xff] %v2806_v1  ;;  %4072 = vst [vmem:[#allocation24_spill] sm:$0xff] %v2809_v57  ;;  %v320_v52 = vmul.f32 0.020408163, %v184_v44  ;;  %v319_v55 = vmul.f32 0.020408163, %v181_v54  ;;  %v454_v40 = vmul.f32 %v2806_v1, %v2806_v1  ;;  %v453_v60 = vmul.f32 %v2809_v57, %v2809_v57 }
  0xcf   :  { %v2818_v29 = vsub.f32 %v2378_v3, %v320_v52  ;;  %v2821_v61 = vsub.f32 %v2383_v4, %v319_v55  ;;  %v581_v28 = vsel %vm82_vm0, %v453_v60, 0.0  ;;  %v584_v23 = vsel %vm82_vm0, %v454_v40, 0.0 }
  0xd0   :  { %579 = vadd.xlane.f32.xlu1 %v578_v20  ;;  %v190_v48 = vpop.xlane.xlu1 %189  ;;  %582 = vadd.xlane.f32.xlu0 %v581_v28  ;;  %v187_v36 = vpop.xlane.xlu0 %186 }
  0xd1   :  { %4073 = vst [vmem:[#allocation25_spill] sm:$0xff] %v2818_v29  ;;  %4074 = vst [vmem:[#allocation26_spill] sm:$0xff] %v2821_v61  ;;  %v322_v56 = vmul.f32 0.020408163, %v190_v48  ;;  %v321_v12 = vmul.f32 0.020408163, %v187_v36  ;;  %v456_v44 = vmul.f32 %v2818_v29, %v2818_v29  ;;  %v455_v3 = vmul.f32 %v2821_v61, %v2821_v61 }
  0xd2   :  { %v1064_v29 = vld [vmem:[%s3989_s2 + $0xe8] sm:$0xff] }
  0xd3   :  { %v2830_v54 = vsub.f32 %v2392_v10, %v322_v56  ;;  %v2833_v4 = vsub.f32 %v2397_v11, %v321_v12  ;;  %v587_v20 = vsel %vm82_vm0, %v455_v3, 0.0  ;;  %v590_v55 = vsel %vm82_vm0, %v456_v44, 0.0 }
  0xd4   :  { %585 = vadd.xlane.f32.xlu1 %v584_v23  ;;  %v196_v52 = vpop.xlane.xlu1 %195  ;;  %588 = vadd.xlane.f32.xlu0 %v587_v20  ;;  %v193_v40 = vpop.xlane.xlu0 %192 }
  0xd5   :  { %4075 = vst [vmem:[#allocation27_spill] sm:$0xff] %v2830_v54  ;;  %4076 = vst [vmem:[#allocation28_spill] sm:$0xff] %v2833_v4  ;;  %v324_v60 = vmul.f32 0.020408163, %v196_v52  ;;  %v323_v28 = vmul.f32 0.020408163, %v193_v40  ;;  %v458_v48 = vmul.f32 %v2830_v54, %v2830_v54  ;;  %v457_v10 = vmul.f32 %v2833_v4, %v2833_v4 }
  0xd6   :  { %v1062_v54 = vld [vmem:[%s3989_s2 + $0xd8] sm:$0xff] }
  0xd7   :  { %v2842_v36 = vsub.f32 %v2406_v18, %v324_v60  ;;  %v2845_v11 = vsub.f32 %v2411_v19, %v323_v28  ;;  %v593_v23 = vsel %vm82_vm0, %v457_v10, 0.0  ;;  %v596_v12 = vsel %vm82_vm0, %v458_v48, 0.0 }
  0xd8   :  { %591 = vadd.xlane.f32.xlu1 %v590_v55  ;;  %v202_v56 = vpop.xlane.xlu1 %201  ;;  %594 = vadd.xlane.f32.xlu0 %v593_v23  ;;  %v199_v44 = vpop.xlane.xlu0 %198 }
  0xd9   :  { %4077 = vst [vmem:[#allocation29_spill] sm:$0xff] %v2842_v36  ;;  %4078 = vst [vmem:[#allocation30_spill] sm:$0xff] %v2845_v11  ;;  %v326_v3 = vmul.f32 0.020408163, %v202_v56  ;;  %v325_v20 = vmul.f32 0.020408163, %v199_v44  ;;  %v460_v52 = vmul.f32 %v2842_v36, %v2842_v36  ;;  %v459_v18 = vmul.f32 %v2845_v11, %v2845_v11 }
  0xda   :  { %v1060_v36 = vld [vmem:[%s3989_s2 + $0xc8] sm:$0xff] }
  0xdb   :  { %v2854_v40 = vsub.f32 %v2420_v26, %v326_v3  ;;  %v2857_v19 = vsub.f32 %v2425_v27, %v325_v20  ;;  %v599_v55 = vsel %vm82_vm0, %v459_v18, 0.0  ;;  %v602_v28 = vsel %vm82_vm0, %v460_v52, 0.0 }
  0xdc   :  { %597 = vadd.xlane.f32.xlu1 %v596_v12  ;;  %v208_v60 = vpop.xlane.xlu1 %207  ;;  %600 = vadd.xlane.f32.xlu0 %v599_v55  ;;  %v205_v48 = vpop.xlane.xlu0 %204 }
  0xdd   :  { %4079 = vst [vmem:[#allocation31_spill] sm:$0xff] %v2854_v40  ;;  %4080 = vst [vmem:[#allocation32_spill] sm:$0xff] %v2857_v19  ;;  %v328_v10 = vmul.f32 0.020408163, %v208_v60  ;;  %v327_v23 = vmul.f32 0.020408163, %v205_v48  ;;  %v462_v56 = vmul.f32 %v2854_v40, %v2854_v40  ;;  %v461_v26 = vmul.f32 %v2857_v19, %v2857_v19 }
  0xde   :  { %v1058_v40 = vld [vmem:[%s3989_s2 + $0xb8] sm:$0xff] }
  0xdf   :  { %v2866_v44 = vsub.f32 %v2434_v34, %v328_v10  ;;  %v2869_v27 = vsub.f32 %v2439_v35, %v327_v23  ;;  %v605_v12 = vsel %vm82_vm0, %v461_v26, 0.0  ;;  %v608_v20 = vsel %vm82_vm0, %v462_v56, 0.0 }
  0xe0   :  { %603 = vadd.xlane.f32.xlu1 %v602_v28  ;;  %v214_v3 = vpop.xlane.xlu1 %213  ;;  %606 = vadd.xlane.f32.xlu0 %v605_v12  ;;  %v211_v52 = vpop.xlane.xlu0 %210 }
  0xe1   :  { %4081 = vst [vmem:[#allocation33_spill] sm:$0xff] %v2866_v44  ;;  %4082 = vst [vmem:[#allocation34_spill] sm:$0xff] %v2869_v27  ;;  %v330_v18 = vmul.f32 0.020408163, %v214_v3  ;;  %v329_v55 = vmul.f32 0.020408163, %v211_v52  ;;  %v464_v60 = vmul.f32 %v2866_v44, %v2866_v44  ;;  %v463_v34 = vmul.f32 %v2869_v27, %v2869_v27 }
  0xe2   :  { %v1056_v44 = vld [vmem:[%s3989_s2 + $0xa8] sm:$0xff] }
  0xe3   :  { %v2878_v48 = vsub.f32 %v2448_v42, %v330_v18  ;;  %v2881_v35 = vsub.f32 %v2453_v43, %v329_v55  ;;  %v611_v28 = vsel %vm82_vm0, %v463_v34, 0.0  ;;  %v614_v23 = vsel %vm82_vm0, %v464_v60, 0.0 }
  0xe4   :  { %609 = vadd.xlane.f32.xlu1 %v608_v20  ;;  %v220_v10 = vpop.xlane.xlu1 %219  ;;  %612 = vadd.xlane.f32.xlu0 %v611_v28  ;;  %v217_v56 = vpop.xlane.xlu0 %216 }
  0xe5   :  { %4083 = vst [vmem:[#allocation35_spill] sm:$0xff] %v2878_v48  ;;  %4084 = vst [vmem:[#allocation36_spill] sm:$0xff] %v2881_v35  ;;  %v332_v26 = vmul.f32 0.020408163, %v220_v10  ;;  %v331_v12 = vmul.f32 0.020408163, %v217_v56  ;;  %v466_v3 = vmul.f32 %v2878_v48, %v2878_v48  ;;  %v465_v42 = vmul.f32 %v2881_v35, %v2881_v35 }
  0xe6   :  { %v1054_v48 = vld [vmem:[%s3989_s2 + $0x98] sm:$0xff] }
  0xe7   :  { %v2890_v52 = vsub.f32 %v2462_v50, %v332_v26  ;;  %v2893_v43 = vsub.f32 %v2467_v51, %v331_v12  ;;  %v617_v20 = vsel %vm82_vm0, %v465_v42, 0.0  ;;  %v620_v55 = vsel %vm82_vm0, %v466_v3, 0.0 }
  0xe8   :  { %615 = vadd.xlane.f32.xlu1 %v614_v23  ;;  %v226_v18 = vpop.xlane.xlu1 %225  ;;  %618 = vadd.xlane.f32.xlu0 %v617_v20  ;;  %v223_v60 = vpop.xlane.xlu0 %222 }
  0xe9   :  { %4085 = vst [vmem:[#allocation37_spill] sm:$0xff] %v2890_v52  ;;  %4086 = vst [vmem:[#allocation38_spill] sm:$0xff] %v2893_v43  ;;  %v334_v34 = vmul.f32 0.020408163, %v226_v18  ;;  %v333_v28 = vmul.f32 0.020408163, %v223_v60  ;;  %v468_v10 = vmul.f32 %v2890_v52, %v2890_v52  ;;  %v467_v50 = vmul.f32 %v2893_v43, %v2893_v43 }
  0xea   :  { %v1052_v52 = vld [vmem:[%s3989_s2 + $0x88] sm:$0xff] }
  0xeb   :  { %v2902_v56 = vsub.f32 %v2476_v58, %v334_v34  ;;  %v2905_v51 = vsub.f32 %v2481_v59, %v333_v28  ;;  %v623_v23 = vsel %vm82_vm0, %v467_v50, 0.0  ;;  %v626_v12 = vsel %vm82_vm0, %v468_v10, 0.0 }
  0xec   :  { %621 = vadd.xlane.f32.xlu1 %v620_v55  ;;  %v232_v26 = vpop.xlane.xlu1 %231  ;;  %624 = vadd.xlane.f32.xlu0 %v623_v23  ;;  %v229_v3 = vpop.xlane.xlu0 %228 }
  0xed   :  { %4087 = vst [vmem:[#allocation39_spill] sm:$0xff] %v2902_v56  ;;  %4088 = vst [vmem:[#allocation40_spill] sm:$0xff] %v2905_v51  ;;  %v336_v42 = vmul.f32 0.020408163, %v232_v26  ;;  %v335_v20 = vmul.f32 0.020408163, %v229_v3  ;;  %v470_v18 = vmul.f32 %v2902_v56, %v2902_v56  ;;  %v469_v58 = vmul.f32 %v2905_v51, %v2905_v51 }
  0xee   :  { %v4091_v3 = vld [vmem:[#allocation2_spill] sm:$0xff] }
  0xef   :  { %v2914_v60 = vsub.f32 %v2490_v6, %v336_v42  ;;  %v2917_v59 = vsub.f32 %v2495_v7, %v335_v20  ;;  %v629_v55 = vsel %vm82_vm0, %v469_v58, 0.0  ;;  %v632_v28 = vsel %vm82_vm0, %v470_v18, 0.0  ;;  %v4093_v7 = vld [vmem:[#allocation3_spill] sm:$0xff] }
  0xf0   :  { %627 = vadd.xlane.f32.xlu1 %v626_v12  ;;  %v238_v34 = vpop.xlane.xlu1 %237  ;;  %630 = vadd.xlane.f32.xlu0 %v629_v55  ;;  %v235_v10 = vpop.xlane.xlu0 %234 }
  0xf1   :  { %4089 = vst [vmem:[#allocation41_spill] sm:$0xff] %v2914_v60  ;;  %4090 = vst [vmem:[#allocation42_spill] sm:$0xff] %v2917_v59  ;;  %v338_v50 = vmul.f32 0.020408163, %v238_v34  ;;  %v337_v23 = vmul.f32 0.020408163, %v235_v10  ;;  %v472_v26 = vmul.f32 %v2914_v60, %v2914_v60  ;;  %v471_v6 = vmul.f32 %v2917_v59, %v2917_v59 }
  0xf3   :  { %v2926_v42 = vsub.f32 %v4091_v3, %v338_v50  ;;  %v2929_v20 = vsub.f32 %v4093_v7, %v337_v23  ;;  %v635_v12 = vsel %vm82_vm0, %v471_v6, 0.0  ;;  %v638_v58 = vsel %vm82_vm0, %v472_v26, 0.0  ;;  %v4095_v3 = vld [vmem:[#allocation4_spill] sm:$0xff]  ;;  %v4097_v23 = vld [vmem:[#allocation5_spill] sm:$0xff] }
  0xf4   :  { %633 = vadd.xlane.f32.xlu1 %v632_v28  ;;  %v244_v18 = vpop.xlane.xlu1 %243  ;;  %636 = vadd.xlane.f32.xlu0 %v635_v12  ;;  %v241_v55 = vpop.xlane.xlu0 %240 }
  0xf5   :  { %4092 = vst [vmem:[#allocation2_spill] sm:$0xff] %v2926_v42  ;;  %4094 = vst [vmem:[#allocation3_spill] sm:$0xff] %v2929_v20  ;;  %v340_v34 = vmul.f32 0.020408163, %v244_v18  ;;  %v339_v10 = vmul.f32 0.020408163, %v241_v55  ;;  %v474_v51 = vmul.f32 %v2926_v42, %v2926_v42  ;;  %v473_v50 = vmul.f32 %v2929_v20, %v2929_v20 }
  0xf7   :  { %v2938_v59 = vsub.f32 %v4095_v3, %v340_v34  ;;  %v2941_v7 = vsub.f32 %v4097_v23, %v339_v10  ;;  %v641_v28 = vsel %vm82_vm0, %v473_v50, 0.0  ;;  %v644_v6 = vsel %vm82_vm0, %v474_v51, 0.0  ;;  %v4099_v3 = vld [vmem:[#allocation6_spill] sm:$0xff]  ;;  %v4101_v10 = vld [vmem:[#allocation7_spill] sm:$0xff] }
  0xf8   :  { %639 = vadd.xlane.f32.xlu1 %v638_v58  ;;  %v250_v26 = vpop.xlane.xlu1 %249  ;;  %642 = vadd.xlane.f32.xlu0 %v641_v28  ;;  %v247_v12 = vpop.xlane.xlu0 %246 }
  0xf9   :  { %4096 = vst [vmem:[#allocation4_spill] sm:$0xff] %v2938_v59  ;;  %4098 = vst [vmem:[#allocation5_spill] sm:$0xff] %v2941_v7  ;;  %v342_v18 = vmul.f32 0.020408163, %v250_v26  ;;  %v341_v55 = vmul.f32 0.020408163, %v247_v12  ;;  %v476_v42 = vmul.f32 %v2938_v59, %v2938_v59  ;;  %v475_v34 = vmul.f32 %v2941_v7, %v2941_v7 }
  0xfb   :  { %v2950_v20 = vsub.f32 %v4099_v3, %v342_v18  ;;  %v2953_v23 = vsub.f32 %v4101_v10, %v341_v55  ;;  %v647_v58 = vsel %vm82_vm0, %v475_v34, 0.0  ;;  %v650_v50 = vsel %vm82_vm0, %v476_v42, 0.0  ;;  %v4103_v3 = vld [vmem:[#allocation8_spill] sm:$0xff]  ;;  %v4105_v55 = vld [vmem:[#allocation9_spill] sm:$0xff] }
  0xfc   :  { %645 = vadd.xlane.f32.xlu1 %v644_v6  ;;  %v256_v51 = vpop.xlane.xlu1 %255  ;;  %648 = vadd.xlane.f32.xlu0 %v647_v58  ;;  %v253_v28 = vpop.xlane.xlu0 %252 }
  0xfd   :  { %4100 = vst [vmem:[#allocation6_spill] sm:$0xff] %v2950_v20  ;;  %4102 = vst [vmem:[#allocation7_spill] sm:$0xff] %v2953_v23  ;;  %v344_v26 = vmul.f32 0.020408163, %v256_v51  ;;  %v343_v12 = vmul.f32 0.020408163, %v253_v28  ;;  %v478_v59 = vmul.f32 %v2950_v20, %v2950_v20  ;;  %v477_v18 = vmul.f32 %v2953_v23, %v2953_v23 }
  0xff   :  { %v2962_v7 = vsub.f32 %v4103_v3, %v344_v26  ;;  %v2965_v10 = vsub.f32 %v4105_v55, %v343_v12  ;;  %v653_v6 = vsel %vm82_vm0, %v477_v18, 0.0  ;;  %v656_v34 = vsel %vm82_vm0, %v478_v59, 0.0  ;;  %v4107_v3 = vld [vmem:[#allocation10_spill] sm:$0xff]  ;;  %v4109_v12 = vld [vmem:[#allocation11_spill] sm:$0xff] }
 0x100   :  { %651 = vadd.xlane.f32.xlu1 %v650_v50  ;;  %v262_v42 = vpop.xlane.xlu1 %261  ;;  %654 = vadd.xlane.f32.xlu0 %v653_v6  ;;  %v259_v58 = vpop.xlane.xlu0 %258 }
 0x101   :  { %4104 = vst [vmem:[#allocation8_spill] sm:$0xff] %v2962_v7  ;;  %4106 = vst [vmem:[#allocation9_spill] sm:$0xff] %v2965_v10  ;;  %v346_v51 = vmul.f32 0.020408163, %v262_v42  ;;  %v345_v28 = vmul.f32 0.020408163, %v259_v58  ;;  %v480_v20 = vmul.f32 %v2962_v7, %v2962_v7  ;;  %v479_v26 = vmul.f32 %v2965_v10, %v2965_v10 }
 0x103   :  { %v2974_v23 = vsub.f32 %v4107_v3, %v346_v51  ;;  %v2977_v55 = vsub.f32 %v4109_v12, %v345_v28  ;;  %v659_v50 = vsel %vm82_vm0, %v479_v26, 0.0  ;;  %v662_v18 = vsel %vm82_vm0, %v480_v20, 0.0  ;;  %v4111_v3 = vld [vmem:[#allocation12_spill] sm:$0xff]  ;;  %v4113_v28 = vld [vmem:[#allocation13_spill] sm:$0xff] }
 0x104   :  { %657 = vadd.xlane.f32.xlu1 %v656_v34  ;;  %v268_v59 = vpop.xlane.xlu1 %267  ;;  %660 = vadd.xlane.f32.xlu0 %v659_v50  ;;  %v265_v6 = vpop.xlane.xlu0 %264 }
 0x105   :  { %4108 = vst [vmem:[#allocation10_spill] sm:$0xff] %v2974_v23  ;;  %4110 = vst [vmem:[#allocation11_spill] sm:$0xff] %v2977_v55  ;;  %v348_v42 = vmul.f32 0.020408163, %v268_v59  ;;  %v347_v58 = vmul.f32 0.020408163, %v265_v6  ;;  %v482_v7 = vmul.f32 %v2974_v23, %v2974_v23  ;;  %v481_v51 = vmul.f32 %v2977_v55, %v2977_v55 }
 0x107   :  { %v2986_v10 = vsub.f32 %v4111_v3, %v348_v42  ;;  %v2989_v12 = vsub.f32 %v4113_v28, %v347_v58  ;;  %v665_v34 = vsel %vm82_vm0, %v481_v51, 0.0  ;;  %v668_v26 = vsel %vm82_vm0, %v482_v7, 0.0  ;;  %v4115_v3 = vld [vmem:[#allocation14_spill] sm:$0xff]  ;;  %v4117_v58 = vld [vmem:[#allocation15_spill] sm:$0xff] }
 0x108   :  { %663 = vadd.xlane.f32.xlu1 %v662_v18  ;;  %v274_v20 = vpop.xlane.xlu1 %273  ;;  %666 = vadd.xlane.f32.xlu0 %v665_v34  ;;  %v271_v50 = vpop.xlane.xlu0 %270 }
 0x109   :  { %4112 = vst [vmem:[#allocation12_spill] sm:$0xff] %v2986_v10  ;;  %4114 = vst [vmem:[#allocation13_spill] sm:$0xff] %v2989_v12  ;;  %v350_v59 = vmul.f32 0.020408163, %v274_v20  ;;  %v349_v6 = vmul.f32 0.020408163, %v271_v50  ;;  %v484_v23 = vmul.f32 %v2986_v10, %v2986_v10  ;;  %v483_v42 = vmul.f32 %v2989_v12, %v2989_v12 }
 0x10b   :  { %v2998_v55 = vsub.f32 %v4115_v3, %v350_v59  ;;  %v3001_v28 = vsub.f32 %v4117_v58, %v349_v6  ;;  %v671_v18 = vsel %vm82_vm0, %v483_v42, 0.0  ;;  %v674_v51 = vsel %vm82_vm0, %v484_v23, 0.0  ;;  %v4119_v3 = vld [vmem:[#allocation16_spill] sm:$0xff]  ;;  %v4121_v6 = vld [vmem:[#allocation17_spill] sm:$0xff] }
 0x10c   :  { %669 = vadd.xlane.f32.xlu1 %v668_v26  ;;  %v280_v7 = vpop.xlane.xlu1 %279  ;;  %672 = vadd.xlane.f32.xlu0 %v671_v18  ;;  %v277_v34 = vpop.xlane.xlu0 %276 }
 0x10d   :  { %4116 = vst [vmem:[#allocation14_spill] sm:$0xff] %v2998_v55  ;;  %4118 = vst [vmem:[#allocation15_spill] sm:$0xff] %v3001_v28  ;;  %v352_v20 = vmul.f32 0.020408163, %v280_v7  ;;  %v351_v50 = vmul.f32 0.020408163, %v277_v34  ;;  %v486_v10 = vmul.f32 %v2998_v55, %v2998_v55  ;;  %v485_v59 = vmul.f32 %v3001_v28, %v3001_v28 }
 0x10f   :  { %v3010_v12 = vsub.f32 %v4119_v3, %v352_v20  ;;  %v3013_v58 = vsub.f32 %v4121_v6, %v351_v50  ;;  %v677_v26 = vsel %vm82_vm0, %v485_v59, 0.0  ;;  %v680_v42 = vsel %vm82_vm0, %v486_v10, 0.0  ;;  %v4123_v3 = vld [vmem:[#allocation18_spill] sm:$0xff] }
 0x110   :  { %675 = vadd.xlane.f32.xlu1 %v674_v51  ;;  %v286_v23 = vpop.xlane.xlu1 %285  ;;  %678 = vadd.xlane.f32.xlu0 %v677_v26  ;;  %v283_v18 = vpop.xlane.xlu0 %282 }
 0x111   :  { %4120 = vst [vmem:[#allocation16_spill] sm:$0xff] %v3010_v12  ;;  %4122 = vst [vmem:[#allocation17_spill] sm:$0xff] %v3013_v58  ;;  %v354_v7 = vmul.f32 0.020408163, %v286_v23  ;;  %v353_v34 = vmul.f32 0.020408163, %v283_v18  ;;  %v488_v55 = vmul.f32 %v3010_v12, %v3010_v12  ;;  %v487_v20 = vmul.f32 %v3013_v58, %v3013_v58 }
 0x113   :  { %v3022_v28 = vsub.f32 %v4123_v3, %v354_v7  ;;  %v3025_v50 = vsub.f32 %v2621_v47, %v353_v34  ;;  %v683_v51 = vsel %vm82_vm0, %v487_v20, 0.0  ;;  %v686_v10 = vsel %vm82_vm0, %v488_v55, 0.0 }
 0x114   :  { %681 = vadd.xlane.f32.xlu1 %v680_v42  ;;  %684 = vadd.xlane.f32.xlu0 %v683_v51 }
 0x115   :  { %4124 = vst [vmem:[#allocation18_spill] sm:$0xff] %v3022_v28  ;;  %4125 = vst [vmem:[#allocation43_spill] sm:$0xff] %v3025_v50  ;;  %v490_v59 = vmul.f32 %v3022_v28, %v3022_v28  ;;  %v489_v6 = vmul.f32 %v3025_v50, %v3025_v50 }
 0x117   :  { %v689_v26 = vsel %vm82_vm0, %v489_v6, 0.0  ;;  %v692_v23 = vsel %vm82_vm0, %v490_v59, 0.0 }
 0x118   :  { %687 = vadd.xlane.f32.xlu1 %v686_v10  ;;  %690 = vadd.xlane.f32.xlu0 %v689_v26 }
 0x11c   :  { %693 = vadd.xlane.f32.xlu1 %v692_v23 }
 0x11d   :  { %v493_v47 = vpop.xlane.xlu0 %492 }
 0x11e   :  { %v695_v18 = vmul.f32 0.020408163, %v493_v47 }
 0x120   :  { %v831_v7 = vadd.f32 1e-05, %v695_v18 }
 0x121   :  { %v496_v42 = vpop.xlane.xlu1 %495  ;;  %v499_v34 = vpop.xlane.xlu0 %498 }
 0x122   :  { %1994 = vrsqrt.f32 %v831_v7  ;;  %v696_v55 = vmul.f32 0.020408163, %v496_v42  ;;  %v697_v20 = vmul.f32 0.020408163, %v499_v34  ;;  %v763_v7 = vld [vmem:[%s3988_s1] sm:$0xff] }
 0x124   :  { %v832_v3 = vadd.f32 1e-05, %v696_v55  ;;  %v833_v51 = vadd.f32 1e-05, %v697_v20 }
 0x125   :  { %v502_v58 = vpop.xlane.xlu1 %501  ;;  %v505_v28 = vpop.xlane.xlu0 %504 }
 0x126   :  { %1996 = vrsqrt.f32 %v832_v3  ;;  %v698_v50 = vmul.f32 0.020408163, %v502_v58  ;;  %v699_v6 = vmul.f32 0.020408163, %v505_v28 }
 0x127   :  { %1998 = vrsqrt.f32 %v833_v51 }
 0x128   :  { %v834_v10 = vadd.f32 1e-05, %v698_v50  ;;  %v835_v47 = vadd.f32 1e-05, %v699_v6  ;;  %v764_v50 = vld [vmem:[%s3988_s1 + $0x8] sm:$0xff] }
 0x129   :  { %v508_v26 = vpop.xlane.xlu1 %507  ;;  %v511_v59 = vpop.xlane.xlu0 %510 }
 0x12a   :  { %2000 = vrsqrt.f32 %v834_v10  ;;  %v700_v23 = vmul.f32 0.020408163, %v508_v26  ;;  %v701_v12 = vmul.f32 0.020408163, %v511_v59  ;;  %v765_v10 = vld [vmem:[%s3988_s1 + $0x10] sm:$0xff] }
 0x12b   :  { %2002 = vrsqrt.f32 %v835_v47 }
 0x12c   :  { %v836_v34 = vadd.f32 1e-05, %v700_v23  ;;  %v837_v28 = vadd.f32 1e-05, %v701_v12 }
 0x12d   :  { %v514_v18 = vpop.xlane.xlu1 %513  ;;  %v517_v42 = vpop.xlane.xlu0 %516 }
 0x12e   :  { %2004 = vrsqrt.f32 %v836_v34  ;;  %v702_v59 = vmul.f32 0.020408163, %v514_v18  ;;  %v703_v34 = vmul.f32 0.020408163, %v517_v42 }
 0x12f   :  { %v1995_v55 = vpop.eup %1994  ;;  %2006 = vrsqrt.f32 %v837_v28 }
 0x130   :  { %v967_v20 = vmul.f32 %v1995_v55, %v763_v7 }
 0x131   :  { %v520_v58 = vpop.xlane.xlu1 %519  ;;  %v523_v3 = vpop.xlane.xlu0 %522 }
 0x132   :  { %v704_v51 = vmul.f32 0.020408163, %v520_v58  ;;  %1105 = vperm.xlu0 %1992, %v967_v20   ;;  %v766_v20 = vld [vmem:[%s3988_s1 + $0x18] sm:$0xff]  ;;  %v838_v58 = vadd.f32 1e-05, %v702_v59 }
 0x133   :  { %v1997_v6 = vpop.eup %1996 }
 0x134   :  { %v1999_v26 = vpop.eup %1998  ;;  %v840_v23 = vadd.f32 1e-05, %v704_v51  ;;  %v968_v47 = vmul.f32 %v1997_v6, %v764_v50  ;;  %v839_v51 = vadd.f32 1e-05, %v703_v34  ;;  %v705_v6 = vmul.f32 0.020408163, %v523_v3 }
 0x135   :  { %v526_v7 = vpop.xlane.xlu1 %525  ;;  %v529_v12 = vpop.xlane.xlu0 %528  ;;  %v969_v43 = vmul.f32 %v1999_v26, %v765_v10  ;;  %v767_v10 = vld [vmem:[%s3988_s1 + $0x20] sm:$0xff] }
 0x136   :  { %2008 = vrsqrt.f32 %v840_v23  ;;  %v706_v55 = vmul.f32 0.020408163, %v526_v7  ;;  %1110 = vperm.xlu1 %1993, %v968_v47  }
 0x137   :  { %v2001_v60 = vpop.eup %2000 }
 0x138   :  { %v842_v35 = vadd.f32 1e-05, %v706_v55  ;;  %v970_v28 = vmul.f32 %v2001_v60, %v766_v20  ;;  %v2003_v50 = vpop.eup %2002  ;;  %v772_v55 = vld [vmem:[%s3988_s1 + $0x48] sm:$0xff] }
 0x139   :  { %v532_v56 = vpop.xlane.xlu1 %531  ;;  %v535_v27 = vpop.xlane.xlu0 %534  ;;  %v971_v47 = vmul.f32 %v2003_v50, %v767_v10 }
 0x13a   :  { %2010 = vrsqrt.f32 %v842_v35  ;;  %v708_v18 = vmul.f32 0.020408163, %v532_v56  ;;  %1115 = vperm.xlu1 %1993, %v969_v43   ;;  %v841_v35 = vadd.f32 1e-05, %v705_v6  ;;  %v707_v43 = vmul.f32 0.020408163, %v529_v12 }
 0x13b   :  { %2012 = vrsqrt.f32 %v838_v58  ;;  %v2005_v7 = vpop.eup %2004  ;;  %v768_v56 = vld [vmem:[%s3988_s1 + $0x28] sm:$0xff]  ;;  %v709_v12 = vmul.f32 0.020408163, %v535_v27 }
 0x13c   :  { %v844_v42 = vadd.f32 1e-05, %v708_v18  ;;  %v2007_v20 = vpop.eup %2006  ;;  %v972_v18 = vmul.f32 %v2005_v7, %v768_v56  ;;  %v843_v50 = vadd.f32 1e-05, %v707_v43 }
 0x13d   :  { %v538_v26 = vpop.xlane.xlu1 %537  ;;  %v541_v23 = vpop.xlane.xlu0 %540  ;;  %v845_v27 = vadd.f32 1e-05, %v709_v12 }
 0x13e   :  { %2014 = vrsqrt.f32 %v844_v42  ;;  %v710_v59 = vmul.f32 0.020408163, %v538_v26  ;;  %1120 = vperm.xlu1 %1993, %v970_v28   ;;  %v774_v26 = vld [vmem:[%s3988_s1 + $0x58] sm:$0xff] }
 0x13f   :  { %2016 = vrsqrt.f32 %v839_v51  ;;  %v769_v51 = vld [vmem:[%s3988_s1 + $0x30] sm:$0xff] }
 0x140   :  { %v846_v60 = vadd.f32 1e-05, %v710_v59 }
 0x141   :  { %v544_v3 = vpop.xlane.xlu1 %543  ;;  %v547_v34 = vpop.xlane.xlu0 %546 }
 0x142   :  { %2018 = vrsqrt.f32 %v846_v60  ;;  %v712_v58 = vmul.f32 0.020408163, %v544_v3  ;;  %1125 = vperm.xlu1 %1993, %v971_v47   ;;  %v973_v47 = vmul.f32 %v2007_v20, %v769_v51  ;;  %v713_v51 = vmul.f32 0.020408163, %v547_v34 }
 0x143   :  { %v2009_v28 = vpop.eup %2008  ;;  %2020 = vrsqrt.f32 %v841_v35  ;;  %v711_v35 = vmul.f32 0.020408163, %v541_v23 }
 0x144   :  { %v848_v6 = vadd.f32 1e-05, %v712_v58  ;;  %v976_v10 = vmul.f32 %v2009_v28, %v772_v55  ;;  %v776_v55 = vld [vmem:[%s3988_s1 + $0x68] sm:$0xff]  ;;  %v770_v28 = vld [vmem:[%s3988_s1 + $0x38] sm:$0xff] }
 0x145   :  { %v550_v42 = vpop.xlane.xlu1 %549  ;;  %v553_v59 = vpop.xlane.xlu0 %552  ;;  %v847_v23 = vadd.f32 1e-05, %v711_v35 }
 0x146   :  { %2022 = vrsqrt.f32 %v848_v6  ;;  %v714_v60 = vmul.f32 0.020408163, %v550_v42  ;;  %1150 = vperm.xlu0 %1992, %v976_v10   ;;  %1130 = vperm.xlu1 %1993, %v972_v18   ;;  %v715_v35 = vmul.f32 0.020408163, %v553_v59 }
 0x147   :  { %v2011_v7 = vpop.eup %2010  ;;  %2024 = vrsqrt.f32 %v843_v50 }
 0x148   :  { %v850_v43 = vadd.f32 1e-05, %v714_v60  ;;  %v978_v56 = vmul.f32 %v2011_v7, %v774_v26  ;;  %v2013_v3 = vpop.eup %2012  ;;  %v771_v26 = vld [vmem:[%s3988_s1 + $0x40] sm:$0xff]  ;;  %v778_v7 = vld [vmem:[%s3988_s1 + $0x78] sm:$0xff] }
 0x149   :  { %v556_v58 = vpop.xlane.xlu1 %555  ;;  %v559_v6 = vpop.xlane.xlu0 %558  ;;  %v974_v42 = vmul.f32 %v2013_v3, %v770_v28  ;;  %v849_v3 = vadd.f32 1e-05, %v713_v51  ;;  %v773_v28 = vld [vmem:[%s3988_s1 + $0x50] sm:$0xff] }
 0x14a   :  { %2026 = vrsqrt.f32 %v850_v43  ;;  %v716_v18 = vmul.f32 0.020408163, %v556_v58  ;;  %1160 = vperm.xlu0 %1992, %v978_v56   ;;  %1135 = vperm.xlu1 %1993, %v973_v47  }
 0x14b   :  { %v2015_v20 = vpop.eup %2014  ;;  %2028 = vrsqrt.f32 %v845_v27 }
 0x14c   :  { %v2017_v50 = vpop.eup %2016  ;;  %v852_v12 = vadd.f32 1e-05, %v716_v18  ;;  %v980_v10 = vmul.f32 %v2015_v20, %v776_v55  ;;  %v780_v20 = vld [vmem:[%s3988_s1 + $0x88] sm:$0xff] }
 0x14d   :  { %v562_v60 = vpop.xlane.xlu1 %561  ;;  %v565_v43 = vpop.xlane.xlu0 %564  ;;  %v975_v56 = vmul.f32 %v2017_v50, %v771_v26  ;;  %v851_v50 = vadd.f32 1e-05, %v715_v35  ;;  %v717_v26 = vmul.f32 0.020408163, %v559_v6  ;;  %v777_v6 = vld [vmem:[%s3988_s1 + $0x70] sm:$0xff] }
 0x14e   :  { %2030 = vrsqrt.f32 %v852_v12  ;;  %v718_v47 = vmul.f32 0.020408163, %v562_v60  ;;  %1170 = vperm.xlu0 %1992, %v980_v10   ;;  %1140 = vperm.xlu1 %1993, %v974_v42  }
 0x14f   :  { %v2019_v27 = vpop.eup %2018  ;;  %2032 = vrsqrt.f32 %v847_v23 }
 0x150   :  { %v2021_v34 = vpop.eup %2020  ;;  %v854_v58 = vadd.f32 1e-05, %v718_v47  ;;  %v982_v55 = vmul.f32 %v2019_v27, %v778_v7  ;;  %v775_v7 = vld [vmem:[%s3988_s1 + $0x60] sm:$0xff]  ;;  %v782_v27 = vld [vmem:[%s3988_s1 + $0x98] sm:$0xff] }
 0x151   :  { %v568_v18 = vpop.xlane.xlu1 %567  ;;  %v571_v12 = vpop.xlane.xlu0 %570  ;;  %v977_v23 = vmul.f32 %v2021_v34, %v773_v28 }
 0x152   :  { %2034 = vrsqrt.f32 %v854_v58  ;;  %v720_v10 = vmul.f32 0.020408163, %v568_v18  ;;  %1180 = vperm.xlu0 %1992, %v982_v55   ;;  %1145 = vperm.xlu1 %1993, %v975_v56   ;;  %v853_v55 = vadd.f32 1e-05, %v717_v26  ;;  %v719_v18 = vmul.f32 0.020408163, %v565_v43 }
 0x153   :  { %v2023_v59 = vpop.eup %2022  ;;  %2036 = vrsqrt.f32 %v849_v3 }
 0x154   :  { %v2025_v51 = vpop.eup %2024  ;;  %v856_v42 = vadd.f32 1e-05, %v720_v10  ;;  %v984_v60 = vmul.f32 %v2023_v59, %v780_v20  ;;  %v784_v59 = vld [vmem:[%s3988_s1 + $0xa8] sm:$0xff] }
 0x155   :  { %v574_v47 = vpop.xlane.xlu1 %573  ;;  %v577_v58 = vpop.xlane.xlu0 %576  ;;  %v979_v34 = vmul.f32 %v2025_v51, %v775_v7  ;;  %v721_v51 = vmul.f32 0.020408163, %v571_v12  ;;  %v855_v7 = vadd.f32 1e-05, %v719_v18 }
 0x156   :  { %2038 = vrsqrt.f32 %v856_v42  ;;  %v722_v56 = vmul.f32 0.020408163, %v574_v47  ;;  %1190 = vperm.xlu0 %1992, %v984_v60   ;;  %1155 = vperm.xlu1 %1993, %v977_v23  }
 0x157   :  { %v2027_v35 = vpop.eup %2026  ;;  %2040 = vrsqrt.f32 %v851_v50 }
 0x158   :  { %v2029_v3 = vpop.eup %2028  ;;  %v858_v28 = vadd.f32 1e-05, %v722_v56  ;;  %v986_v20 = vmul.f32 %v2027_v35, %v782_v27  ;;  %v786_v27 = vld [vmem:[%s3988_s1 + $0xb8] sm:$0xff]  ;;  %v779_v35 = vld [vmem:[%s3988_s1 + $0x80] sm:$0xff] }
 0x159   :  { %v580_v10 = vpop.xlane.xlu1 %579  ;;  %v583_v42 = vpop.xlane.xlu0 %582  ;;  %v981_v60 = vmul.f32 %v2029_v3, %v777_v6  ;;  %v857_v6 = vadd.f32 1e-05, %v721_v51  ;;  %v723_v3 = vmul.f32 0.020408163, %v577_v58 }
 0x15a   :  { %2042 = vrsqrt.f32 %v858_v28  ;;  %v724_v23 = vmul.f32 0.020408163, %v580_v10  ;;  %1200 = vperm.xlu0 %1992, %v986_v20   ;;  %1165 = vperm.xlu1 %1993, %v979_v34  }
 0x15b   :  { %v2031_v50 = vpop.eup %2030  ;;  %2044 = vrsqrt.f32 %v853_v55  ;;  %v859_v51 = vadd.f32 1e-05, %v723_v3 }
 0x15c   :  { %v860_v47 = vadd.f32 1e-05, %v724_v23  ;;  %v988_v26 = vmul.f32 %v2031_v50, %v784_v59  ;;  %v2033_v56 = vpop.eup %2032  ;;  %v788_v23 = vld [vmem:[%s3988_s1 + $0xc8] sm:$0xff]  ;;  %v781_v50 = vld [vmem:[%s3988_s1 + $0x90] sm:$0xff] }
 0x15d   :  { %v586_v43 = vpop.xlane.xlu1 %585  ;;  %v589_v28 = vpop.xlane.xlu0 %588  ;;  %v983_v20 = vmul.f32 %v2033_v56, %v779_v35 }
 0x15e   :  { %2046 = vrsqrt.f32 %v860_v47  ;;  %v726_v34 = vmul.f32 0.020408163, %v586_v43  ;;  %1210 = vperm.xlu0 %1992, %v988_v26   ;;  %1175 = vperm.xlu1 %1993, %v981_v60   ;;  %v727_v3 = vmul.f32 0.020408163, %v589_v28 }
 0x15f   :  { %v2035_v12 = vpop.eup %2034  ;;  %2048 = vrsqrt.f32 %v855_v7  ;;  %v725_v7 = vmul.f32 0.020408163, %v583_v42 }
 0x160   :  { %v862_v55 = vadd.f32 1e-05, %v726_v34  ;;  %v990_v18 = vmul.f32 %v2035_v12, %v786_v27  ;;  %v2037_v10 = vpop.eup %2036  ;;  %v790_v34 = vld [vmem:[%s3988_s1 + $0xd8] sm:$0xff]  ;;  %v783_v12 = vld [vmem:[%s3988_s1 + $0xa0] sm:$0xff]  ;;  %v863_v28 = vadd.f32 1e-05, %v727_v3 }
 0x161   :  { %v592_v59 = vpop.xlane.xlu1 %591  ;;  %v595_v47 = vpop.xlane.xlu0 %594  ;;  %v985_v27 = vmul.f32 %v2037_v10, %v781_v50  ;;  %v861_v42 = vadd.f32 1e-05, %v725_v7 }
 0x162   :  { %2050 = vrsqrt.f32 %v862_v55  ;;  %v728_v60 = vmul.f32 0.020408163, %v592_v59  ;;  %1220 = vperm.xlu0 %1992, %v990_v18   ;;  %1185 = vperm.xlu1 %1993, %v983_v20   ;;  %v729_v7 = vmul.f32 0.020408163, %v595_v47 }
 0x163   :  { %v2039_v58 = vpop.eup %2038  ;;  %2052 = vrsqrt.f32 %v857_v6 }
 0x164   :  { %v2041_v26 = vpop.eup %2040  ;;  %v864_v56 = vadd.f32 1e-05, %v728_v60  ;;  %v992_v43 = vmul.f32 %v2039_v58, %v788_v23  ;;  %v792_v60 = vld [vmem:[%s3988_s1 + $0xe8] sm:$0xff]  ;;  %v785_v58 = vld [vmem:[%s3988_s1 + $0xb0] sm:$0xff]  ;;  %v865_v47 = vadd.f32 1e-05, %v729_v7 }
 0x165   :  { %v598_v35 = vpop.xlane.xlu1 %597  ;;  %v601_v55 = vpop.xlane.xlu0 %600  ;;  %v987_v59 = vmul.f32 %v2041_v26, %v783_v12 }
 0x166   :  { %2054 = vrsqrt.f32 %v864_v56  ;;  %v730_v18 = vmul.f32 0.020408163, %v598_v35  ;;  %1230 = vperm.xlu0 %1992, %v992_v43   ;;  %1195 = vperm.xlu1 %1993, %v985_v27  }
 0x167   :  { %v2043_v6 = vpop.eup %2042  ;;  %2056 = vrsqrt.f32 %v859_v51 }
 0x168   :  { %v866_v20 = vadd.f32 1e-05, %v730_v18  ;;  %v994_v10 = vmul.f32 %v2043_v6, %v790_v34  ;;  %v2045_v23 = vpop.eup %2044  ;;  %v794_v18 = vld [vmem:[%s3988_s1 + $0xf8] sm:$0xff]  ;;  %v787_v6 = vld [vmem:[%s3988_s1 + $0xc0] sm:$0xff] }
 0x169   :  { %v604_v50 = vpop.xlane.xlu1 %603  ;;  %v607_v56 = vpop.xlane.xlu0 %606  ;;  %v989_v35 = vmul.f32 %v2045_v23, %v785_v58  ;;  %v731_v23 = vmul.f32 0.020408163, %v601_v55  ;;  %v789_v58 = vld [vmem:[%s3988_s1 + $0xd0] sm:$0xff]  ;;  %v791_v55 = vld [vmem:[%s3988_s1 + $0xe0] sm:$0xff] }
 0x16a   :  { %2058 = vrsqrt.f32 %v866_v20  ;;  %v732_v43 = vmul.f32 0.020408163, %v604_v50  ;;  %1240 = vperm.xlu0 %1992, %v994_v10   ;;  %1205 = vperm.xlu1 %1993, %v987_v59  }
 0x16b   :  { %v2047_v51 = vpop.eup %2046  ;;  %2060 = vrsqrt.f32 %v861_v42 }
 0x16c   :  { %v868_v26 = vadd.f32 1e-05, %v732_v43  ;;  %v996_v27 = vmul.f32 %v2047_v51, %v792_v60  ;;  %v2049_v34 = vpop.eup %2048  ;;  %v796_v51 = vld [vmem:[%s3988_s1 + $0x108] sm:$0xff] }
 0x16d   :  { %v610_v12 = vpop.xlane.xlu1 %609  ;;  %v613_v20 = vpop.xlane.xlu0 %612  ;;  %v991_v60 = vmul.f32 %v2049_v34, %v787_v6  ;;  %v867_v34 = vadd.f32 1e-05, %v731_v23 }
 0x16e   :  { %2062 = vrsqrt.f32 %v868_v26  ;;  %v734_v10 = vmul.f32 0.020408163, %v610_v12  ;;  %1250 = vperm.xlu0 %1992, %v996_v27   ;;  %1215 = vperm.xlu1 %1993, %v989_v35  }
 0x16f   :  { %v2051_v42 = vpop.eup %2050  ;;  %2064 = vrsqrt.f32 %v863_v28 }
 0x170   :  { %v2053_v3 = vpop.eup %2052  ;;  %v870_v59 = vadd.f32 1e-05, %v734_v10  ;;  %v998_v50 = vmul.f32 %v2051_v42, %v794_v18  ;;  %v733_v18 = vmul.f32 0.020408163, %v607_v56  ;;  %v798_v42 = vld [vmem:[%s3988_s1 + $0x118] sm:$0xff]  ;;  %v793_v56 = vld [vmem:[%s3988_s1 + $0xf0] sm:$0xff] }
 0x171   :  { %v616_v43 = vpop.xlane.xlu1 %615  ;;  %v619_v26 = vpop.xlane.xlu0 %618  ;;  %v993_v7 = vmul.f32 %v2053_v3, %v789_v58  ;;  %v735_v3 = vmul.f32 0.020408163, %v613_v20 }
 0x172   :  { %2066 = vrsqrt.f32 %v870_v59  ;;  %v736_v27 = vmul.f32 0.020408163, %v616_v43  ;;  %1260 = vperm.xlu0 %1992, %v998_v50   ;;  %1225 = vperm.xlu1 %1993, %v991_v60   ;;  %v869_v43 = vadd.f32 1e-05, %v733_v18 }
 0x173   :  { %v2055_v28 = vpop.eup %2054  ;;  %2068 = vrsqrt.f32 %v865_v47 }
 0x174   :  { %v2057_v35 = vpop.eup %2056  ;;  %v872_v12 = vadd.f32 1e-05, %v736_v27  ;;  %v1000_v6 = vmul.f32 %v2055_v28, %v796_v51  ;;  %v800_v28 = vld [vmem:[%s3988_s1 + $0x128] sm:$0xff] }
 0x175   :  { %v622_v10 = vpop.xlane.xlu1 %621  ;;  %v625_v59 = vpop.xlane.xlu0 %624  ;;  %v995_v60 = vmul.f32 %v2057_v35, %v791_v55  ;;  %v871_v55 = vadd.f32 1e-05, %v735_v3 }
 0x176   :  { %2070 = vrsqrt.f32 %v872_v12  ;;  %v738_v50 = vmul.f32 0.020408163, %v622_v10  ;;  %1270 = vperm.xlu0 %1992, %v1000_v6   ;;  %1235 = vperm.xlu1 %1993, %v993_v7   ;;  %v737_v6 = vmul.f32 0.020408163, %v619_v26  ;;  %v797_v26 = vld [vmem:[%s3988_s1 + $0x110] sm:$0xff] }
 0x177   :  { %v2059_v47 = vpop.eup %2058  ;;  %2072 = vrsqrt.f32 %v867_v34 }
 0x178   :  { %v2061_v58 = vpop.eup %2060  ;;  %v874_v23 = vadd.f32 1e-05, %v738_v50  ;;  %v1002_v27 = vmul.f32 %v2059_v47, %v798_v42  ;;  %v795_v42 = vld [vmem:[%s3988_s1 + $0x100] sm:$0xff]  ;;  %v802_v47 = vld [vmem:[%s3988_s1 + $0x138] sm:$0xff] }
 0x179   :  { %v628_v51 = vpop.xlane.xlu1 %627  ;;  %v631_v12 = vpop.xlane.xlu0 %630  ;;  %v997_v35 = vmul.f32 %v2061_v58, %v793_v56 }
 0x17a   :  { %2074 = vrsqrt.f32 %v874_v23  ;;  %v740_v7 = vmul.f32 0.020408163, %v628_v51  ;;  %1280 = vperm.xlu0 %1992, %v1002_v27   ;;  %1245 = vperm.xlu1 %1993, %v995_v60   ;;  %v873_v27 = vadd.f32 1e-05, %v737_v6  ;;  %v739_v51 = vmul.f32 0.020408163, %v625_v59 }
 0x17b   :  { %v2063_v20 = vpop.eup %2062  ;;  %2076 = vrsqrt.f32 %v869_v43 }
 0x17c   :  { %v2065_v34 = vpop.eup %2064  ;;  %v876_v18 = vadd.f32 1e-05, %v740_v7  ;;  %v1004_v10 = vmul.f32 %v2063_v20, %v800_v28  ;;  %v804_v20 = vld [vmem:[%s3988_s1 + $0x148] sm:$0xff] }
 0x17d   :  { %v634_v50 = vpop.xlane.xlu1 %633  ;;  %v637_v23 = vpop.xlane.xlu0 %636  ;;  %v999_v58 = vmul.f32 %v2065_v34, %v795_v42  ;;  %v741_v34 = vmul.f32 0.020408163, %v631_v12  ;;  %v875_v42 = vadd.f32 1e-05, %v739_v51 }
 0x17e   :  { %2078 = vrsqrt.f32 %v876_v18  ;;  %v742_v60 = vmul.f32 0.020408163, %v634_v50  ;;  %1290 = vperm.xlu0 %1992, %v1004_v10   ;;  %1255 = vperm.xlu1 %1993, %v997_v35  }
 0x17f   :  { %v2067_v3 = vpop.eup %2066  ;;  %2080 = vrsqrt.f32 %v871_v55 }
 0x180   :  { %v2069_v43 = vpop.eup %2068  ;;  %v878_v56 = vadd.f32 1e-05, %v742_v60  ;;  %v1006_v28 = vmul.f32 %v2067_v3, %v802_v47  ;;  %v806_v47 = vld [vmem:[%s3988_s1 + $0x158] sm:$0xff]  ;;  %v799_v3 = vld [vmem:[%s3988_s1 + $0x120] sm:$0xff] }
 0x181   :  { %v640_v7 = vpop.xlane.xlu1 %639  ;;  %v643_v18 = vpop.xlane.xlu0 %642  ;;  %v1001_v10 = vmul.f32 %v2069_v43, %v797_v26  ;;  %v877_v26 = vadd.f32 1e-05, %v741_v34  ;;  %v743_v43 = vmul.f32 0.020408163, %v637_v23 }
 0x182   :  { %2082 = vrsqrt.f32 %v878_v56  ;;  %v744_v35 = vmul.f32 0.020408163, %v640_v7  ;;  %1300 = vperm.xlu0 %1992, %v1006_v28   ;;  %1265 = vperm.xlu1 %1993, %v999_v58  }
 0x183   :  { %v2071_v55 = vpop.eup %2070  ;;  %2084 = vrsqrt.f32 %v873_v27  ;;  %v879_v34 = vadd.f32 1e-05, %v743_v43 }
 0x184   :  { %v880_v50 = vadd.f32 1e-05, %v744_v35  ;;  %v1008_v6 = vmul.f32 %v2071_v55, %v804_v20  ;;  %v2073_v60 = vpop.eup %2072  ;;  %v808_v35 = vld [vmem:[%s3988_s1 + $0x168] sm:$0xff]  ;;  %v801_v55 = vld [vmem:[%s3988_s1 + $0x130] sm:$0xff] }
 0x185   :  { %v646_v59 = vpop.xlane.xlu1 %645  ;;  %v649_v56 = vpop.xlane.xlu0 %648  ;;  %v1003_v28 = vmul.f32 %v2073_v60, %v799_v3 }
 0x186   :  { %2086 = vrsqrt.f32 %v880_v50  ;;  %v746_v58 = vmul.f32 0.020408163, %v646_v59  ;;  %1310 = vperm.xlu0 %1992, %v1008_v6   ;;  %1275 = vperm.xlu1 %1993, %v1001_v10   ;;  %v747_v43 = vmul.f32 0.020408163, %v649_v56 }
 0x187   :  { %v2075_v12 = vpop.eup %2074  ;;  %2088 = vrsqrt.f32 %v875_v42  ;;  %v745_v42 = vmul.f32 0.020408163, %v643_v18 }
 0x188   :  { %v882_v27 = vadd.f32 1e-05, %v746_v58  ;;  %v1010_v51 = vmul.f32 %v2075_v12, %v806_v47  ;;  %v2077_v7 = vpop.eup %2076  ;;  %v810_v58 = vld [vmem:[%s3988_s1 + $0x178] sm:$0xff]  ;;  %v803_v12 = vld [vmem:[%s3988_s1 + $0x140] sm:$0xff]  ;;  %v883_v56 = vadd.f32 1e-05, %v747_v43 }
 0x189   :  { %v652_v20 = vpop.xlane.xlu1 %651  ;;  %v655_v50 = vpop.xlane.xlu0 %654  ;;  %v1005_v47 = vmul.f32 %v2077_v7, %v801_v55  ;;  %v881_v18 = vadd.f32 1e-05, %v745_v42 }
 0x18a   :  { %2090 = vrsqrt.f32 %v882_v27  ;;  %v748_v10 = vmul.f32 0.020408163, %v652_v20  ;;  %1320 = vperm.xlu0 %1992, %v1010_v51   ;;  %1285 = vperm.xlu1 %1993, %v1003_v28   ;;  %v749_v42 = vmul.f32 0.020408163, %v655_v50 }
 0x18b   :  { %v2079_v23 = vpop.eup %2078  ;;  %2092 = vrsqrt.f32 %v877_v26 }
 0x18c   :  { %v2081_v6 = vpop.eup %2080  ;;  %v884_v60 = vadd.f32 1e-05, %v748_v10  ;;  %v1012_v59 = vmul.f32 %v2079_v23, %v808_v35  ;;  %v812_v10 = vld [vmem:[%s3988_s1 + $0x188] sm:$0xff]  ;;  %v805_v23 = vld [vmem:[%s3988_s1 + $0x150] sm:$0xff]  ;;  %v885_v50 = vadd.f32 1e-05, %v749_v42 }
 0x18d   :  { %v658_v3 = vpop.xlane.xlu1 %657  ;;  %v661_v27 = vpop.xlane.xlu0 %660  ;;  %v1007_v20 = vmul.f32 %v2081_v6, %v803_v12 }
 0x18e   :  { %2094 = vrsqrt.f32 %v884_v60  ;;  %v750_v51 = vmul.f32 0.020408163, %v658_v3  ;;  %1330 = vperm.xlu0 %1992, %v1012_v59   ;;  %1295 = vperm.xlu1 %1993, %v1005_v47  }
 0x18f   :  { %v2083_v26 = vpop.eup %2082  ;;  %2096 = vrsqrt.f32 %v879_v34 }
 0x190   :  { %v886_v28 = vadd.f32 1e-05, %v750_v51  ;;  %v1014_v7 = vmul.f32 %v2083_v26, %v810_v58  ;;  %v2085_v35 = vpop.eup %2084  ;;  %v814_v51 = vld [vmem:[%s3988_s1 + $0x198] sm:$0xff]  ;;  %v807_v26 = vld [vmem:[%s3988_s1 + $0x160] sm:$0xff] }
 0x191   :  { %v664_v55 = vpop.xlane.xlu1 %663  ;;  %v667_v59 = vpop.xlane.xlu0 %666  ;;  %v1009_v3 = vmul.f32 %v2085_v35, %v805_v23 }
 0x192   :  { %2098 = vrsqrt.f32 %v886_v28  ;;  %v752_v60 = vmul.f32 0.020408163, %v664_v55  ;;  %1340 = vperm.xlu0 %1992, %v1014_v7   ;;  %1305 = vperm.xlu1 %1993, %v1007_v20   ;;  %v751_v20 = vmul.f32 0.020408163, %v661_v27  ;;  %v811_v27 = vld [vmem:[%s3988_s1 + $0x180] sm:$0xff] }
 0x193   :  { %v2087_v34 = vpop.eup %2086  ;;  %2100 = vrsqrt.f32 %v881_v18 }
 0x194   :  { %v888_v6 = vadd.f32 1e-05, %v752_v60  ;;  %v1016_v47 = vmul.f32 %v2087_v34, %v812_v10  ;;  %v2089_v58 = vpop.eup %2088  ;;  %v809_v10 = vld [vmem:[%s3988_s1 + $0x170] sm:$0xff]  ;;  %v816_v34 = vld [vmem:[%s3988_s1 + $0x1a8] sm:$0xff] }
 0x195   :  { %v670_v12 = vpop.xlane.xlu1 %669  ;;  %v1011_v55 = vmul.f32 %v2089_v58, %v807_v26  ;;  %v673_v60 = vpop.xlane.xlu0 %672 }
 0x196   :  { %2102 = vrsqrt.f32 %v888_v6  ;;  %v754_v28 = vmul.f32 0.020408163, %v670_v12  ;;  %1350 = vperm.xlu0 %1992, %v1016_v47   ;;  %1315 = vperm.xlu1 %1993, %v1009_v3   ;;  %v887_v3 = vadd.f32 1e-05, %v751_v20  ;;  %v753_v12 = vmul.f32 0.020408163, %v667_v59 }
 0x197   :  { %v2091_v18 = vpop.eup %2090  ;;  %2104 = vrsqrt.f32 %v883_v56  ;;  %v813_v59 = vld [vmem:[%s3988_s1 + $0x190] sm:$0xff] }
 0x198   :  { %v2093_v43 = vpop.eup %2092  ;;  %v890_v7 = vadd.f32 1e-05, %v754_v28  ;;  %v1018_v35 = vmul.f32 %v2091_v18, %v814_v51  ;;  %v818_v28 = vld [vmem:[%s3988_s1 + $0x1b8] sm:$0xff] }
 0x199   :  { %v676_v23 = vpop.xlane.xlu1 %675  ;;  %v1013_v42 = vmul.f32 %v2093_v43, %v809_v10  ;;  %v755_v43 = vmul.f32 0.020408163, %v673_v60  ;;  %v889_v10 = vadd.f32 1e-05, %v753_v12 }
 0x19a   :  { %2106 = vrsqrt.f32 %v890_v7  ;;  %v756_v6 = vmul.f32 0.020408163, %v676_v23  ;;  %1360 = vperm.xlu0 %1992, %v1018_v35   ;;  %1325 = vperm.xlu1 %1993, %v1011_v55   ;;  %v679_v7 = vpop.xlane.xlu0 %678 }
 0x19b   :  { %v2095_v56 = vpop.eup %2094  ;;  %2108 = vrsqrt.f32 %v885_v50 }
 0x19c   :  { %v2097_v47 = vpop.eup %2096  ;;  %v892_v58 = vadd.f32 1e-05, %v756_v6  ;;  %v1020_v51 = vmul.f32 %v2095_v56, %v816_v34  ;;  %v820_v6 = vld [vmem:[%s3988_s1 + $0x1c8] sm:$0xff] }
 0x19d   :  { %v682_v26 = vpop.xlane.xlu1 %681  ;;  %v1015_v35 = vmul.f32 %v2097_v47, %v811_v27 }
 0x19e   :  { %2110 = vrsqrt.f32 %v892_v58  ;;  %v758_v18 = vmul.f32 0.020408163, %v682_v26  ;;  %1370 = vperm.xlu0 %1992, %v1020_v51   ;;  %1335 = vperm.xlu1 %1993, %v1013_v42   ;;  %v891_v42 = vadd.f32 1e-05, %v755_v43  ;;  %v757_v58 = vmul.f32 0.020408163, %v679_v7 }
 0x19f   :  { %v2099_v50 = vpop.eup %2098  ;;  %2112 = vrsqrt.f32 %v887_v3  ;;  %v815_v51 = vld [vmem:[%s3988_s1 + $0x1a0] sm:$0xff]  ;;  %v817_v7 = vld [vmem:[%s3988_s1 + $0x1b0] sm:$0xff] }
 0x1a0   :  { %v2101_v55 = vpop.eup %2100  ;;  %v894_v20 = vadd.f32 1e-05, %v758_v18  ;;  %v1022_v23 = vmul.f32 %v2099_v50, %v818_v28  ;;  %v685_v28 = vpop.xlane.xlu0 %684  ;;  %v822_v18 = vld [vmem:[%s3988_s1 + $0x1d8] sm:$0xff] }
 0x1a1   :  { %v688_v34 = vpop.xlane.xlu1 %687  ;;  %v1017_v27 = vmul.f32 %v2101_v55, %v813_v59 }
 0x1a2   :  { %2114 = vrsqrt.f32 %v894_v20  ;;  %v760_v56 = vmul.f32 0.020408163, %v688_v34  ;;  %1380 = vperm.xlu0 %1992, %v1022_v23   ;;  %1345 = vperm.xlu1 %1993, %v1015_v35   ;;  %v759_v23 = vmul.f32 0.020408163, %v685_v28  ;;  %v824_v34 = vld [vmem:[%s3988_s1 + $0x1e8] sm:$0xff] }
 0x1a3   :  { %v2103_v60 = vpop.eup %2102  ;;  %2116 = vrsqrt.f32 %v889_v10  ;;  %v893_v10 = vadd.f32 1e-05, %v757_v58  ;;  %v826_v58 = vld [vmem:[%s3988_s1 + $0x1f8] sm:$0xff] }
 0x1a4   :  { %v2105_v47 = vpop.eup %2104  ;;  %v896_v3 = vadd.f32 1e-05, %v760_v56  ;;  %v1024_v12 = vmul.f32 %v2103_v60, %v820_v6  ;;  %v691_v56 = vpop.xlane.xlu0 %690 }
 0x1a5   :  { %v694_v26 = vpop.xlane.xlu1 %693  ;;  %v1019_v35 = vmul.f32 %v2105_v47, %v815_v51 }
 0x1a6   :  { %2118 = vrsqrt.f32 %v896_v3  ;;  %v762_v50 = vmul.f32 0.020408163, %v694_v26  ;;  %1390 = vperm.xlu0 %1992, %v1024_v12   ;;  %1355 = vperm.xlu1 %1993, %v1017_v27   ;;  %v761_v27 = vmul.f32 0.020408163, %v691_v56  ;;  %v819_v12 = vld [vmem:[%s3988_s1 + $0x1c0] sm:$0xff] }
 0x1a7   :  { %v2107_v43 = vpop.eup %2106  ;;  %2120 = vrsqrt.f32 %v891_v42  ;;  %v895_v42 = vadd.f32 1e-05, %v759_v23 }
 0x1a8   :  { %v2109_v55 = vpop.eup %2108  ;;  %v898_v20 = vadd.f32 1e-05, %v762_v50  ;;  %v1026_v59 = vmul.f32 %v2107_v43, %v822_v18  ;;  %v897_v26 = vadd.f32 1e-05, %v761_v27 }
 0x1a9   :  { %v1021_v60 = vmul.f32 %v2109_v55, %v817_v7  ;;  %v821_v7 = vld [vmem:[%s3988_s1 + $0x1d0] sm:$0xff] }
 0x1aa   :  { %2122 = vrsqrt.f32 %v898_v20  ;;  %1400 = vperm.xlu0 %1992, %v1026_v59   ;;  %1365 = vperm.xlu1 %1993, %v1019_v35   ;;  %v828_v35 = vld [vmem:[%s3988_s1 + $0x208] sm:$0xff] }
 0x1ab   :  { %v2111_v6 = vpop.eup %2110  ;;  %2124 = vrsqrt.f32 %v893_v10 }
 0x1ac   :  { %v1028_v47 = vmul.f32 %v2111_v6, %v824_v34  ;;  %v2113_v3 = vpop.eup %2112  ;;  %2126 = vrsqrt.f32 %v895_v42  ;;  %v830_v34 = vld [vmem:[%s3988_s1 + $0x218] sm:$0xff]  ;;  %v823_v6 = vld [vmem:[%s3988_s1 + $0x1e0] sm:$0xff] }
 0x1ad   :  { %v1023_v18 = vmul.f32 %v2113_v3, %v819_v12  ;;  %2128 = vrsqrt.f32 %v897_v26  ;;  %v825_v3 = vld [vmem:[%s3988_s1 + $0x1f0] sm:$0xff]  ;;  %v3242_v26 = vpop.permute.xlu0 %1105 }
 0x1ae   :  { %1410 = vperm.xlu0 %1992, %v1028_v47   ;;  %1375 = vperm.xlu1 %1993, %v1021_v60  }
 0x1af   :  { %v2115_v51 = vpop.eup %2114 }
 0x1b0   :  { %v1030_v28 = vmul.f32 %v2115_v51, %v826_v58  ;;  %v2117_v50 = vpop.eup %2116  ;;  %v1036_v58 = vld [vmem:[%s3989_s2 + $0x8] sm:$0xff] }
 0x1b1   :  { %v3218_v43 = vpop.permute.xlu1 %1110  ;;  %v1025_v23 = vmul.f32 %v2117_v50, %v821_v7  ;;  %v1038_v50 = vld [vmem:[%s3989_s2 + $0x18] sm:$0xff] }
 0x1b2   :  { %1420 = vperm.xlu0 %1992, %v1030_v28   ;;  %1385 = vperm.xlu1 %1993, %v1023_v18   ;;  %v827_v18 = vld [vmem:[%s3988_s1 + $0x200] sm:$0xff] }
 0x1b3   :  { %v2119_v55 = vpop.eup %2118 }
 0x1b4   :  { %v2121_v10 = vpop.eup %2120  ;;  %v1032_v20 = vmul.f32 %v2119_v55, %v828_v35 }
 0x1b5   :  { %v3226_v59 = vpop.permute.xlu1 %1115  ;;  %v1027_v42 = vmul.f32 %v2121_v10, %v823_v6 }
 0x1b6   :  { %1430 = vperm.xlu0 %1992, %v1032_v20   ;;  %1395 = vperm.xlu1 %1993, %v1025_v23   ;;  %v829_v20 = vld [vmem:[%s3988_s1 + $0x210] sm:$0xff]  ;;  %v1040_v23 = vld [vmem:[%s3989_s2 + $0x28] sm:$0xff] }
 0x1b7   :  { %v2123_v56 = vpop.eup %2122 }
 0x1b8   :  { %v1034_v60 = vmul.f32 %v2123_v56, %v830_v34  ;;  %v2125_v27 = vpop.eup %2124 }
 0x1b9   :  { %v3234_v47 = vpop.permute.xlu1 %1120  ;;  %v1029_v12 = vmul.f32 %v2125_v27, %v825_v3  ;;  %v2127_v51 = vpop.eup %2126 }
 0x1ba   :  { %1440 = vperm.xlu0 %1992, %v1034_v60   ;;  %1405 = vperm.xlu1 %1993, %v1027_v42   ;;  %v1031_v35 = vmul.f32 %v2127_v51, %v827_v18  ;;  %v2129_v7 = vpop.eup %2128  ;;  %v1042_v60 = vld [vmem:[%s3989_s2 + $0x38] sm:$0xff]  ;;  %v1035_v42 = vld [vmem:[%s3989_s2] sm:$0xff] }
 0x1bb   :  { %v1033_v34 = vmul.f32 %v2129_v7, %v829_v20 }
 0x1bd   :  { %v3244_v28 = vpop.permute.xlu1 %1125 }
 0x1be   :  { %1518 = vperm.xlu0 %1992, %v1036_v58   ;;  %1415 = vperm.xlu1 %1993, %v1029_v12   ;;  %v1044_v58 = vld [vmem:[%s3989_s2 + $0x48] sm:$0xff]  ;;  %v1037_v12 = vld [vmem:[%s3989_s2 + $0x10] sm:$0xff] }
 0x1c1   :  { %v3252_v55 = vpop.permute.xlu1 %1130  ;;  %v3254_v10 = vpop.permute.xlu0 %1150 }
 0x1c2   :  { %1528 = vperm.xlu0 %1992, %v1038_v50   ;;  %1425 = vperm.xlu1 %1993, %v1031_v35   ;;  %v1046_v50 = vld [vmem:[%s3989_s2 + $0x58] sm:$0xff]  ;;  %v1039_v35 = vld [vmem:[%s3989_s2 + $0x20] sm:$0xff] }
 0x1c5   :  { %v3262_v6 = vpop.permute.xlu1 %1135  ;;  %v3264_v56 = vpop.permute.xlu0 %1160 }
 0x1c6   :  { %1538 = vperm.xlu0 %1992, %v1040_v23   ;;  %1435 = vperm.xlu1 %1993, %v1033_v34   ;;  %v1048_v23 = vld [vmem:[%s3989_s2 + $0x68] sm:$0xff]  ;;  %v1041_v34 = vld [vmem:[%s3989_s2 + $0x30] sm:$0xff] }
 0x1c9   :  { %v3272_v27 = vpop.permute.xlu1 %1140  ;;  %v3274_v3 = vpop.permute.xlu0 %1170 }
 0x1ca   :  { %1548 = vperm.xlu0 %1992, %v1042_v60   ;;  %1513 = vperm.xlu1 %1993, %v1035_v42  }
 0x1cd   :  { %v3282_v51 = vpop.permute.xlu1 %1145  ;;  %v3284_v18 = vpop.permute.xlu0 %1180 }
 0x1ce   :  { %1558 = vperm.xlu0 %1992, %v1044_v58   ;;  %1523 = vperm.xlu1 %1993, %v1037_v12   ;;  %v1050_v58 = vld [vmem:[%s3989_s2 + $0x78] sm:$0xff]  ;;  %v1043_v12 = vld [vmem:[%s3989_s2 + $0x40] sm:$0xff] }
 0x1d1   :  { %v3292_v7 = vpop.permute.xlu1 %1155  ;;  %v3294_v20 = vpop.permute.xlu0 %1190 }
 0x1d2   :  { %1568 = vperm.xlu0 %1992, %v1046_v50   ;;  %1533 = vperm.xlu1 %1993, %v1039_v35  }
 0x1d5   :  { %v3302_v60 = vpop.permute.xlu1 %1165  ;;  %v3304_v42 = vpop.permute.xlu0 %1200 }
 0x1d6   :  { %1578 = vperm.xlu0 %1992, %v1048_v23   ;;  %1543 = vperm.xlu1 %1993, %v1041_v34   ;;  %v1045_v23 = vld [vmem:[%s3989_s2 + $0x50] sm:$0xff] }
 0x1d9   :  { %v3312_v50 = vpop.permute.xlu1 %1175  ;;  %v3314_v35 = vpop.permute.xlu0 %1210 }
 0x1da   :  { %1588 = vperm.xlu0 %1992, %v1050_v58   ;;  %1553 = vperm.xlu1 %1993, %v1043_v12   ;;  %v1047_v58 = vld [vmem:[%s3989_s2 + $0x60] sm:$0xff] }
 0x1dd   :  { %v3322_v34 = vpop.permute.xlu1 %1185  ;;  %v3324_v19 = vpop.permute.xlu0 %1220 }
 0x1de   :  { %1598 = vperm.xlu0 %1992, %v1052_v52   ;;  %1563 = vperm.xlu1 %1993, %v1045_v23   ;;  %v1049_v52 = vld [vmem:[%s3989_s2 + $0x70] sm:$0xff] }
 0x1e1   :  { %v3332_v12 = vpop.permute.xlu1 %1195  ;;  %v3334_v11 = vpop.permute.xlu0 %1230 }
 0x1e2   :  { %1608 = vperm.xlu0 %1992, %v1054_v48   ;;  %1573 = vperm.xlu1 %1993, %v1047_v58   ;;  %v1051_v48 = vld [vmem:[%s3989_s2 + $0x80] sm:$0xff] }
 0x1e5   :  { %v3342_v23 = vpop.permute.xlu1 %1205  ;;  %v3344_v4 = vpop.permute.xlu0 %1240 }
 0x1e6   :  { %1618 = vperm.xlu0 %1992, %v1056_v44   ;;  %1583 = vperm.xlu1 %1993, %v1049_v52   ;;  %v1053_v44 = vld [vmem:[%s3989_s2 + $0x90] sm:$0xff] }
 0x1e9   :  { %v3352_v58 = vpop.permute.xlu1 %1215  ;;  %v3354_v61 = vpop.permute.xlu0 %1250 }
 0x1ea   :  { %1628 = vperm.xlu0 %1992, %v1058_v40   ;;  %1593 = vperm.xlu1 %1993, %v1051_v48   ;;  %v1055_v40 = vld [vmem:[%s3989_s2 + $0xa0] sm:$0xff] }
 0x1ed   :  { %v3362_v52 = vpop.permute.xlu1 %1225  ;;  %v3364_v57 = vpop.permute.xlu0 %1260 }
 0x1ee   :  { %4126 = vst [vmem:[#allocation44_spill] sm:$0xff] %v3364_v57  ;;  %1638 = vperm.xlu0 %1992, %v1060_v36   ;;  %1603 = vperm.xlu1 %1993, %v1053_v44   ;;  %v1057_v36 = vld [vmem:[%s3989_s2 + $0xb0] sm:$0xff] }
 0x1f1   :  { %v3372_v48 = vpop.permute.xlu1 %1235  ;;  %v3374_v53 = vpop.permute.xlu0 %1270 }
 0x1f2   :  { %4127 = vst [vmem:[#allocation45_spill] sm:$0xff] %v3372_v48  ;;  %4128 = vst [vmem:[#allocation46_spill] sm:$0xff] %v3374_v53  ;;  %1648 = vperm.xlu0 %1992, %v1062_v54   ;;  %1613 = vperm.xlu1 %1993, %v1055_v40   ;;  %v1066_v53 = vld [vmem:[%s3989_s2 + $0xf8] sm:$0xff]  ;;  %v1059_v54 = vld [vmem:[%s3989_s2 + $0xc0] sm:$0xff] }
 0x1f5   :  { %v3382_v44 = vpop.permute.xlu1 %1245  ;;  %v3384_v49 = vpop.permute.xlu0 %1280 }
 0x1f6   :  { %4129 = vst [vmem:[#allocation47_spill] sm:$0xff] %v3382_v44  ;;  %4130 = vst [vmem:[#allocation48_spill] sm:$0xff] %v3384_v49  ;;  %1658 = vperm.xlu0 %1992, %v1064_v29   ;;  %1623 = vperm.xlu1 %1993, %v1057_v36   ;;  %v1068_v49 = vld [vmem:[%s3989_s2 + $0x108] sm:$0xff]  ;;  %v1061_v29 = vld [vmem:[%s3989_s2 + $0xd0] sm:$0xff] }
 0x1f9   :  { %v3392_v40 = vpop.permute.xlu1 %1255  ;;  %v3394_v48 = vpop.permute.xlu0 %1290 }
 0x1fa   :  { %4131 = vst [vmem:[#allocation49_spill] sm:$0xff] %v3392_v40  ;;  %4132 = vst [vmem:[#allocation50_spill] sm:$0xff] %v3394_v48  ;;  %1668 = vperm.xlu0 %1992, %v1066_v53   ;;  %1633 = vperm.xlu1 %1993, %v1059_v54   ;;  %v1063_v48 = vld [vmem:[%s3989_s2 + $0xe0] sm:$0xff]  ;;  %v1070_v53 = vld [vmem:[%s3989_s2 + $0x118] sm:$0xff] }
 0x1fd   :  { %v3402_v36 = vpop.permute.xlu1 %1265  ;;  %v3404_v44 = vpop.permute.xlu0 %1300 }
 0x1fe   :  { %4133 = vst [vmem:[#allocation51_spill] sm:$0xff] %v3402_v36  ;;  %4134 = vst [vmem:[#allocation52_spill] sm:$0xff] %v3404_v44  ;;  %1678 = vperm.xlu0 %1992, %v1068_v49   ;;  %1643 = vperm.xlu1 %1993, %v1061_v29   ;;  %v1065_v44 = vld [vmem:[%s3989_s2 + $0xf0] sm:$0xff]  ;;  %v1072_v49 = vld [vmem:[%s3989_s2 + $0x128] sm:$0xff] }
 0x201   :  { %v3412_v54 = vpop.permute.xlu1 %1275  ;;  %v3414_v40 = vpop.permute.xlu0 %1310 }
 0x202   :  { %4135 = vst [vmem:[#allocation53_spill] sm:$0xff] %v3412_v54  ;;  %4136 = vst [vmem:[#allocation54_spill] sm:$0xff] %v3414_v40  ;;  %1653 = vperm.xlu1 %1993, %v1063_v48   ;;  %1688 = vperm.xlu0 %1992, %v1070_v53   ;;  %v1067_v40 = vld [vmem:[%s3989_s2 + $0x100] sm:$0xff]  ;;  %v1074_v48 = vld [vmem:[%s3989_s2 + $0x138] sm:$0xff] }
 0x205   :  { %v3422_v29 = vpop.permute.xlu1 %1285  ;;  %v3424_v36 = vpop.permute.xlu0 %1320 }
 0x206   :  { %4137 = vst [vmem:[#allocation55_spill] sm:$0xff] %v3422_v29  ;;  %4138 = vst [vmem:[#allocation56_spill] sm:$0xff] %v3424_v36  ;;  %1663 = vperm.xlu1 %1993, %v1065_v44   ;;  %1698 = vperm.xlu0 %1992, %v1072_v49   ;;  %v1069_v36 = vld [vmem:[%s3989_s2 + $0x110] sm:$0xff]  ;;  %v1076_v44 = vld [vmem:[%s3989_s2 + $0x148] sm:$0xff] }
 0x209   :  { %v3432_v53 = vpop.permute.xlu1 %1295  ;;  %v3434_v54 = vpop.permute.xlu0 %1330 }
 0x20a   :  { %4139 = vst [vmem:[#allocation57_spill] sm:$0xff] %v3432_v53  ;;  %4140 = vst [vmem:[#allocation58_spill] sm:$0xff] %v3434_v54  ;;  %1673 = vperm.xlu1 %1993, %v1067_v40   ;;  %1708 = vperm.xlu0 %1992, %v1074_v48   ;;  %v1071_v54 = vld [vmem:[%s3989_s2 + $0x120] sm:$0xff]  ;;  %v1078_v40 = vld [vmem:[%s3989_s2 + $0x158] sm:$0xff] }
 0x20d   :  { %v3442_v49 = vpop.permute.xlu1 %1305  ;;  %v3444_v29 = vpop.permute.xlu0 %1340 }
 0x20e   :  { %4141 = vst [vmem:[#allocation59_spill] sm:$0xff] %v3442_v49  ;;  %4142 = vst [vmem:[#allocation60_spill] sm:$0xff] %v3444_v29  ;;  %1683 = vperm.xlu1 %1993, %v1069_v36   ;;  %1718 = vperm.xlu0 %1992, %v1076_v44   ;;  %v1073_v29 = vld [vmem:[%s3989_s2 + $0x130] sm:$0xff]  ;;  %v1080_v36 = vld [vmem:[%s3989_s2 + $0x168] sm:$0xff] }
 0x211   :  { %v3452_v48 = vpop.permute.xlu1 %1315  ;;  %v3454_v53 = vpop.permute.xlu0 %1350 }
 0x212   :  { %4143 = vst [vmem:[#allocation61_spill] sm:$0xff] %v3452_v48  ;;  %4144 = vst [vmem:[#allocation62_spill] sm:$0xff] %v3454_v53  ;;  %1693 = vperm.xlu1 %1993, %v1071_v54   ;;  %1728 = vperm.xlu0 %1992, %v1078_v40   ;;  %v1075_v53 = vld [vmem:[%s3989_s2 + $0x140] sm:$0xff]  ;;  %v1082_v54 = vld [vmem:[%s3989_s2 + $0x178] sm:$0xff] }
 0x215   :  { %v3462_v44 = vpop.permute.xlu1 %1325  ;;  %v3464_v49 = vpop.permute.xlu0 %1360 }
 0x216   :  { %4145 = vst [vmem:[#allocation63_spill] sm:$0xff] %v3462_v44  ;;  %4146 = vst [vmem:[#allocation64_spill] sm:$0xff] %v3464_v49  ;;  %1703 = vperm.xlu1 %1993, %v1073_v29   ;;  %1738 = vperm.xlu0 %1992, %v1080_v36   ;;  %v1077_v49 = vld [vmem:[%s3989_s2 + $0x150] sm:$0xff]  ;;  %v1084_v29 = vld [vmem:[%s3989_s2 + $0x188] sm:$0xff] }
 0x219   :  { %v3472_v40 = vpop.permute.xlu1 %1335  ;;  %v3474_v48 = vpop.permute.xlu0 %1370 }
 0x21a   :  { %4147 = vst [vmem:[#allocation65_spill] sm:$0xff] %v3472_v40  ;;  %4148 = vst [vmem:[#allocation66_spill] sm:$0xff] %v3474_v48  ;;  %1713 = vperm.xlu1 %1993, %v1075_v53   ;;  %1748 = vperm.xlu0 %1992, %v1082_v54   ;;  %v1079_v48 = vld [vmem:[%s3989_s2 + $0x160] sm:$0xff]  ;;  %v1086_v53 = vld [vmem:[%s3989_s2 + $0x198] sm:$0xff] }
 0x21d   :  { %v3482_v36 = vpop.permute.xlu1 %1345  ;;  %v3484_v44 = vpop.permute.xlu0 %1380 }
 0x21e   :  { %4149 = vst [vmem:[#allocation67_spill] sm:$0xff] %v3482_v36  ;;  %4150 = vst [vmem:[#allocation68_spill] sm:$0xff] %v3484_v44  ;;  %1723 = vperm.xlu1 %1993, %v1077_v49   ;;  %1758 = vperm.xlu0 %1992, %v1084_v29   ;;  %v1081_v44 = vld [vmem:[%s3989_s2 + $0x170] sm:$0xff]  ;;  %v1088_v49 = vld [vmem:[%s3989_s2 + $0x1a8] sm:$0xff] }
 0x221   :  { %v3492_v54 = vpop.permute.xlu1 %1355  ;;  %v3494_v40 = vpop.permute.xlu0 %1390 }
 0x222   :  { %4151 = vst [vmem:[#allocation69_spill] sm:$0xff] %v3492_v54  ;;  %4152 = vst [vmem:[#allocation70_spill] sm:$0xff] %v3494_v40  ;;  %1733 = vperm.xlu1 %1993, %v1079_v48   ;;  %1768 = vperm.xlu0 %1992, %v1086_v53   ;;  %v1083_v40 = vld [vmem:[%s3989_s2 + $0x180] sm:$0xff]  ;;  %v1090_v48 = vld [vmem:[%s3989_s2 + $0x1b8] sm:$0xff] }
 0x225   :  { %v3502_v29 = vpop.permute.xlu1 %1365  ;;  %v3504_v36 = vpop.permute.xlu0 %1400 }
 0x226   :  { %4153 = vst [vmem:[#allocation71_spill] sm:$0xff] %v3502_v29  ;;  %4154 = vst [vmem:[#allocation72_spill] sm:$0xff] %v3504_v36  ;;  %1743 = vperm.xlu1 %1993, %v1081_v44   ;;  %1778 = vperm.xlu0 %1992, %v1088_v49   ;;  %v1085_v36 = vld [vmem:[%s3989_s2 + $0x190] sm:$0xff]  ;;  %v1092_v44 = vld [vmem:[%s3989_s2 + $0x1c8] sm:$0xff] }
 0x229   :  { %v3512_v53 = vpop.permute.xlu1 %1375  ;;  %v3514_v54 = vpop.permute.xlu0 %1410 }
 0x22a   :  { %4155 = vst [vmem:[#allocation73_spill] sm:$0xff] %v3512_v53  ;;  %4156 = vst [vmem:[#allocation74_spill] sm:$0xff] %v3514_v54  ;;  %1753 = vperm.xlu1 %1993, %v1083_v40   ;;  %1788 = vperm.xlu0 %1992, %v1090_v48   ;;  %v1087_v54 = vld [vmem:[%s3989_s2 + $0x1a0] sm:$0xff]  ;;  %v1094_v40 = vld [vmem:[%s3989_s2 + $0x1d8] sm:$0xff] }
 0x22d   :  { %v3522_v49 = vpop.permute.xlu1 %1385  ;;  %v3524_v29 = vpop.permute.xlu0 %1420 }
 0x22e   :  { %4157 = vst [vmem:[#allocation75_spill] sm:$0xff] %v3522_v49  ;;  %4158 = vst [vmem:[#allocation76_spill] sm:$0xff] %v3524_v29  ;;  %1763 = vperm.xlu1 %1993, %v1085_v36   ;;  %1798 = vperm.xlu0 %1992, %v1092_v44   ;;  %v1089_v29 = vld [vmem:[%s3989_s2 + $0x1b0] sm:$0xff]  ;;  %v1096_v36 = vld [vmem:[%s3989_s2 + $0x1e8] sm:$0xff] }
 0x231   :  { %v3532_v48 = vpop.permute.xlu1 %1395  ;;  %v3534_v53 = vpop.permute.xlu0 %1430 }
 0x232   :  { %4159 = vst [vmem:[#allocation77_spill] sm:$0xff] %v3532_v48  ;;  %4160 = vst [vmem:[#allocation78_spill] sm:$0xff] %v3534_v53  ;;  %1773 = vperm.xlu1 %1993, %v1087_v54   ;;  %1808 = vperm.xlu0 %1992, %v1094_v40   ;;  %v1091_v53 = vld [vmem:[%s3989_s2 + $0x1c0] sm:$0xff]  ;;  %v1098_v54 = vld [vmem:[%s3989_s2 + $0x1f8] sm:$0xff]  ;;  %v1444_v40 = vmul.f32 %v3218_v43, %v2638_v63 }
 0x235   :  { %v3542_v44 = vpop.permute.xlu1 %1405  ;;  %v3544_v49 = vpop.permute.xlu0 %1440 }
 0x236   :  { %4161 = vst [vmem:[#allocation79_spill] sm:$0xff] %v3544_v49  ;;  %1783 = vperm.xlu1 %1993, %v1089_v29   ;;  %1818 = vperm.xlu0 %1992, %v1096_v36   ;;  %v1093_v29 = vld [vmem:[%s3989_s2 + $0x1d0] sm:$0xff]  ;;  %v1100_v36 = vld [vmem:[%s3989_s2 + $0x208] sm:$0xff]  ;;  %v1446_v49 = vmul.f32 %v3234_v47, %v2641_v14  ;;  %v1448_v14 = vmul.f32 %v3252_v55, %v2650_v2 }
 0x237   :  { %v1450_v2 = vmul.f32 %v3272_v27, %v2662_v15  ;;  %v1452_v15 = vmul.f32 %v3254_v10, %v2674_v0  ;;  %v1447_v0 = vmul.f32 %v3244_v28, %v2654_v22  ;;  %v1454_v10 = vmul.f32 %v3264_v56, %v2686_v5 }
 0x238   :  { %v1449_v22 = vmul.f32 %v3262_v6, %v2665_v9  ;;  %v1456_v5 = vmul.f32 %v3274_v3, %v2698_v30  ;;  %v1451_v9 = vmul.f32 %v3282_v51, %v2677_v13  ;;  %v1458_v30 = vmul.f32 %v3284_v18, %v2710_v46 }
 0x239   :  { %v3554_v48 = vpop.permute.xlu1 %1415  ;;  %v1519_v57 = vpop.permute.xlu0 %1518  ;;  %v1453_v13 = vmul.f32 %v3292_v7, %v2689_v17  ;;  %v1460_v46 = vmul.f32 %v3294_v20, %v2722_v38  ;;  %v1455_v17 = vmul.f32 %v3302_v60, %v2701_v21  ;;  %v1462_v38 = vmul.f32 %v3304_v42, %v2734_v33 }
 0x23a   :  { %v1852_v1 = vadd.f32 %v1519_v57, %v1444_v40  ;;  %1793 = vperm.xlu1 %1993, %v1091_v53   ;;  %1828 = vperm.xlu0 %1992, %v1098_v54   ;;  %v1095_v53 = vld [vmem:[%s3989_s2 + $0x1e0] sm:$0xff]  ;;  %v1102_v54 = vld [vmem:[%s3989_s2 + $0x218] sm:$0xff]  ;;  %v1097_v40 = vld [vmem:[%s3989_s2 + $0x1f0] sm:$0xff]  ;;  %v1457_v21 = vmul.f32 %v3312_v50, %v2713_v25  ;;  %v1464_v33 = vmul.f32 %v3314_v35, %v2746_v62 }
 0x23b   :  { %v1466_v62 = vmul.f32 %v3324_v19, %v2758_v31  ;;  %v1468_v31 = vmul.f32 %v3334_v11, %v2770_v32  ;;  %v1470_v32 = vmul.f32 %v3344_v4, %v2782_v24  ;;  %v1472_v24 = vmul.f32 %v3354_v61, %v2794_v16 }
 0x23c   :  { %1920 = vst.msk [vmem:[%s3990_s3 + $0x8] sm:$0xff] %vm82_vm0, %v1852_v1 }
 0x23d   :  { %v3568_v63 = vpop.permute.xlu1 %1425  ;;  %v1529_v57 = vpop.permute.xlu0 %1528 }
 0x23e   :  { %v1854_v43 = vadd.f32 %v1529_v57, %v1446_v49  ;;  %1803 = vperm.xlu1 %1993, %v1093_v29   ;;  %1838 = vperm.xlu0 %1992, %v1100_v36   ;;  %v1443_v29 = vmul.f32 %v3242_v26, %v2628_v39 }
 0x240   :  { %1922 = vst.msk [vmem:[%s3990_s3 + $0x18] sm:$0xff] %vm82_vm0, %v1854_v43 }
 0x241   :  { %v3582_v1 = vpop.permute.xlu1 %1435  ;;  %v1539_v47 = vpop.permute.xlu0 %1538 }
 0x242   :  { %v1856_v49 = vadd.f32 %v1539_v47, %v1448_v14  ;;  %1813 = vperm.xlu1 %1993, %v1095_v53   ;;  %1848 = vperm.xlu0 %1992, %v1102_v54   ;;  %v1099_v53 = vld [vmem:[%s3989_s2 + $0x200] sm:$0xff]  ;;  %v4162_v54 = vld [vmem:[#allocation19_spill] sm:$0xff] }
 0x243   :  { %v1445_v39 = vmul.f32 %v3226_v59, %v4162_v54  ;;  %v1101_v59 = vld [vmem:[%s3989_s2 + $0x210] sm:$0xff] }
 0x244   :  { %1924 = vst.msk [vmem:[%s3990_s3 + $0x28] sm:$0xff] %vm82_vm0, %v1856_v49 }
 0x245   :  { %v1514_v55 = vpop.permute.xlu1 %1513  ;;  %v1549_v36 = vpop.permute.xlu0 %1548 }
 0x246   :  { %v1851_v57 = vadd.f32 %v1514_v55, %v1443_v29  ;;  %v1858_v43 = vadd.f32 %v1549_v36, %v1450_v2  ;;  %1823 = vperm.xlu1 %1993, %v1097_v40  }
 0x248   :  { %1919 = vst.msk [vmem:[%s3990_s3] sm:$0xff] %vm82_vm0, %v1851_v57  ;;  %1926 = vst.msk [vmem:[%s3990_s3 + $0x38] sm:$0xff] %vm82_vm0, %v1858_v43 }
 0x249   :  { %v1524_v26 = vpop.permute.xlu1 %1523  ;;  %v1559_v27 = vpop.permute.xlu0 %1558 }
 0x24a   :  { %v1853_v14 = vadd.f32 %v1524_v26, %v1445_v39  ;;  %v1860_v47 = vadd.f32 %v1559_v27, %v1452_v15  ;;  %1833 = vperm.xlu1 %1993, %v1099_v53  }
 0x24c   :  { %1921 = vst.msk [vmem:[%s3990_s3 + $0x10] sm:$0xff] %vm82_vm0, %v1853_v14  ;;  %1928 = vst.msk [vmem:[%s3990_s3 + $0x48] sm:$0xff] %vm82_vm0, %v1860_v47  ;;  %v4163_v14 = vld [vmem:[#allocation20_spill] sm:$0xff] }
 0x24d   :  { %v1534_v49 = vpop.permute.xlu1 %1533  ;;  %v1569_v40 = vpop.permute.xlu0 %1568  ;;  %v1459_v25 = vmul.f32 %v3322_v34, %v4163_v14  ;;  %v1461_v34 = vmul.f32 %v3332_v12, %v2737_v8  ;;  %v1463_v8 = vmul.f32 %v3342_v23, %v2749_v37  ;;  %v1465_v37 = vmul.f32 %v3352_v58, %v2761_v41  ;;  %v4164_v58 = vld [vmem:[#allocation23_spill] sm:$0xff] }
 0x24e   :  { %v1855_v29 = vadd.f32 %v1534_v49, %v1447_v0  ;;  %v1862_v2 = vadd.f32 %v1569_v40, %v1454_v10  ;;  %1843 = vperm.xlu1 %1993, %v1101_v59   ;;  %v1467_v41 = vmul.f32 %v3362_v52, %v2773_v45  ;;  %v4168_v52 = vld [vmem:[#allocation25_spill] sm:$0xff] }
 0x250   :  { %1923 = vst.msk [vmem:[%s3990_s3 + $0x20] sm:$0xff] %vm82_vm0, %v1855_v29  ;;  %1930 = vst.msk [vmem:[%s3990_s3 + $0x58] sm:$0xff] %vm82_vm0, %v1862_v2 }
 0x251   :  { %v1544_v28 = vpop.permute.xlu1 %1543  ;;  %v1579_v56 = vpop.permute.xlu0 %1578 }
 0x252   :  { %v1857_v55 = vadd.f32 %v1544_v28, %v1449_v22  ;;  %v1864_v36 = vadd.f32 %v1579_v56, %v1456_v5  ;;  %v4165_v5 = vld [vmem:[#allocation44_spill] sm:$0xff] }
 0x253   :  { %v1474_v16 = vmul.f32 %v4165_v5, %v4164_v58  ;;  %v4188_v58 = vld [vmem:[#allocation35_spill] sm:$0xff]  ;;  %v4189_v5 = vld [vmem:[#allocation56_spill] sm:$0xff] }
 0x254   :  { %1925 = vst.msk [vmem:[%s3990_s3 + $0x30] sm:$0xff] %vm82_vm0, %v1857_v55  ;;  %1932 = vst.msk [vmem:[%s3990_s3 + $0x68] sm:$0xff] %vm82_vm0, %v1864_v36  ;;  %v4166_v36 = vld [vmem:[#allocation21_spill] sm:$0xff] }
 0x255   :  { %v1554_v6 = vpop.permute.xlu1 %1553  ;;  %v1589_v3 = vpop.permute.xlu0 %1588 }
 0x256   :  { %v1859_v57 = vadd.f32 %v1554_v6, %v1451_v9  ;;  %v1866_v43 = vadd.f32 %v1589_v3, %v1458_v30  ;;  %v4167_v9 = vld [vmem:[#allocation45_spill] sm:$0xff]  ;;  %v4169_v30 = vld [vmem:[#allocation46_spill] sm:$0xff] }
 0x257   :  { %v1469_v45 = vmul.f32 %v4167_v9, %v4166_v36  ;;  %v1476_v6 = vmul.f32 %v4169_v30, %v4168_v52  ;;  %v4190_v36 = vld [vmem:[#allocation32_spill] sm:$0xff]  ;;  %v4191_v9 = vld [vmem:[#allocation57_spill] sm:$0xff]  ;;  %v4193_v30 = vld [vmem:[#allocation58_spill] sm:$0xff] }
 0x258   :  { %1927 = vst.msk [vmem:[%s3990_s3 + $0x40] sm:$0xff] %vm82_vm0, %v1859_v57  ;;  %1934 = vst.msk [vmem:[%s3990_s3 + $0x78] sm:$0xff] %vm82_vm0, %v1866_v43  ;;  %v4192_v52 = vld [vmem:[#allocation37_spill] sm:$0xff] }
 0x259   :  { %v1564_v51 = vpop.permute.xlu1 %1563  ;;  %v1599_v18 = vpop.permute.xlu0 %1598 }
 0x25a   :  { %v1861_v53 = vadd.f32 %v1564_v51, %v1453_v13  ;;  %v1868_v54 = vadd.f32 %v1599_v18, %v1460_v46  ;;  %v4170_v46 = vld [vmem:[#allocation22_spill] sm:$0xff]  ;;  %v4171_v51 = vld [vmem:[#allocation47_spill] sm:$0xff] }
 0x25b   :  { %v1471_v18 = vmul.f32 %v4171_v51, %v4170_v46  ;;  %v4194_v46 = vld [vmem:[#allocation34_spill] sm:$0xff]  ;;  %v4195_v51 = vld [vmem:[#allocation59_spill] sm:$0xff] }
 0x25c   :  { %1929 = vst.msk [vmem:[%s3990_s3 + $0x50] sm:$0xff] %vm82_vm0, %v1861_v53  ;;  %1936 = vst.msk [vmem:[%s3990_s3 + $0x88] sm:$0xff] %vm82_vm0, %v1868_v54  ;;  %v4172_v53 = vld [vmem:[#allocation27_spill] sm:$0xff]  ;;  %v4173_v54 = vld [vmem:[#allocation48_spill] sm:$0xff] }
 0x25d   :  { %v1574_v7 = vpop.permute.xlu1 %1573  ;;  %v1609_v20 = vpop.permute.xlu0 %1608 }
 0x25e   :  { %v1863_v39 = vadd.f32 %v1574_v7, %v1455_v17  ;;  %v1870_v15 = vadd.f32 %v1609_v20, %v1462_v38  ;;  %v1478_v17 = vmul.f32 %v4173_v54, %v4172_v53  ;;  %v4196_v53 = vld [vmem:[#allocation39_spill] sm:$0xff]  ;;  %v4197_v54 = vld [vmem:[#allocation60_spill] sm:$0xff] }
 0x260   :  { %1931 = vst.msk [vmem:[%s3990_s3 + $0x60] sm:$0xff] %vm82_vm0, %v1863_v39  ;;  %1938 = vst.msk [vmem:[%s3990_s3 + $0x98] sm:$0xff] %vm82_vm0, %v1870_v15  ;;  %v4174_v15 = vld [vmem:[#allocation24_spill] sm:$0xff] }
 0x261   :  { %v1584_v60 = vpop.permute.xlu1 %1583  ;;  %v1619_v42 = vpop.permute.xlu0 %1618 }
 0x262   :  { %v1865_v26 = vadd.f32 %v1584_v60, %v1457_v21  ;;  %v1872_v27 = vadd.f32 %v1619_v42, %v1464_v33  ;;  %v4175_v21 = vld [vmem:[#allocation49_spill] sm:$0xff]  ;;  %v4177_v42 = vld [vmem:[#allocation50_spill] sm:$0xff] }
 0x263   :  { %v1473_v33 = vmul.f32 %v4175_v21, %v4174_v15  ;;  %v4176_v60 = vld [vmem:[#allocation29_spill] sm:$0xff]  ;;  %v4198_v15 = vld [vmem:[#allocation36_spill] sm:$0xff] }
 0x264   :  { %1933 = vst.msk [vmem:[%s3990_s3 + $0x70] sm:$0xff] %vm82_vm0, %v1865_v26  ;;  %1940 = vst.msk [vmem:[%s3990_s3 + $0xa8] sm:$0xff] %vm82_vm0, %v1872_v27  ;;  %v1480_v26 = vmul.f32 %v4177_v42, %v4176_v60  ;;  %v4199_v21 = vld [vmem:[#allocation61_spill] sm:$0xff]  ;;  %v4201_v42 = vld [vmem:[#allocation62_spill] sm:$0xff] }
 0x265   :  { %v1594_v50 = vpop.permute.xlu1 %1593  ;;  %v1629_v35 = vpop.permute.xlu0 %1628  ;;  %v4200_v60 = vld [vmem:[#allocation41_spill] sm:$0xff] }
 0x266   :  { %v1867_v47 = vadd.f32 %v1594_v50, %v1459_v25  ;;  %v1874_v59 = vadd.f32 %v1629_v35, %v1466_v62  ;;  %v4178_v50 = vld [vmem:[#allocation26_spill] sm:$0xff]  ;;  %v4179_v35 = vld [vmem:[#allocation51_spill] sm:$0xff] }
 0x268   :  { %1935 = vst.msk [vmem:[%s3990_s3 + $0x80] sm:$0xff] %vm82_vm0, %v1867_v47  ;;  %1942 = vst.msk [vmem:[%s3990_s3 + $0xb8] sm:$0xff] %vm82_vm0, %v1874_v59  ;;  %v1475_v47 = vmul.f32 %v4179_v35, %v4178_v50  ;;  %v4180_v59 = vld [vmem:[#allocation31_spill] sm:$0xff]  ;;  %v4202_v50 = vld [vmem:[#allocation38_spill] sm:$0xff] }
 0x269   :  { %v1604_v19 = vpop.permute.xlu1 %1603  ;;  %v1639_v0 = vpop.permute.xlu0 %1638  ;;  %v4203_v35 = vld [vmem:[#allocation63_spill] sm:$0xff] }
 0x26a   :  { %v1869_v10 = vadd.f32 %v1604_v19, %v1461_v34  ;;  %v1876_v49 = vadd.f32 %v1639_v0, %v1468_v31  ;;  %v4181_v34 = vld [vmem:[#allocation52_spill] sm:$0xff] }
 0x26b   :  { %v1482_v31 = vmul.f32 %v4181_v34, %v4180_v59  ;;  %v4204_v59 = vld [vmem:[#allocation2_spill] sm:$0xff]  ;;  %v4205_v34 = vld [vmem:[#allocation64_spill] sm:$0xff] }
 0x26c   :  { %1937 = vst.msk [vmem:[%s3990_s3 + $0x90] sm:$0xff] %vm82_vm0, %v1869_v10  ;;  %1944 = vst.msk [vmem:[%s3990_s3 + $0xc8] sm:$0xff] %vm82_vm0, %v1876_v49 }
 0x26d   :  { %v1614_v11 = vpop.permute.xlu1 %1613  ;;  %v1649_v12 = vpop.permute.xlu0 %1648 }
 0x26e   :  { %v1871_v40 = vadd.f32 %v1614_v11, %v1463_v8  ;;  %v1878_v29 = vadd.f32 %v1649_v12, %v1470_v32  ;;  %v4182_v8 = vld [vmem:[#allocation28_spill] sm:$0xff]  ;;  %v4183_v32 = vld [vmem:[#allocation53_spill] sm:$0xff] }
 0x26f   :  { %v1477_v11 = vmul.f32 %v4183_v32, %v4182_v8  ;;  %v4184_v12 = vld [vmem:[#allocation33_spill] sm:$0xff]  ;;  %v4206_v8 = vld [vmem:[#allocation40_spill] sm:$0xff] }
 0x270   :  { %1939 = vst.msk [vmem:[%s3990_s3 + $0xa0] sm:$0xff] %vm82_vm0, %v1871_v40  ;;  %1946 = vst.msk [vmem:[%s3990_s3 + $0xd8] sm:$0xff] %vm82_vm0, %v1878_v29  ;;  %v4185_v40 = vld [vmem:[#allocation54_spill] sm:$0xff]  ;;  %v4207_v32 = vld [vmem:[#allocation65_spill] sm:$0xff] }
 0x271   :  { %v1624_v4 = vpop.permute.xlu1 %1623  ;;  %v1659_v23 = vpop.permute.xlu0 %1658  ;;  %v1484_v29 = vmul.f32 %v4185_v40, %v4184_v12  ;;  %v4208_v12 = vld [vmem:[#allocation4_spill] sm:$0xff]  ;;  %v4209_v40 = vld [vmem:[#allocation66_spill] sm:$0xff] }
 0x272   :  { %v1873_v2 = vadd.f32 %v1624_v4, %v1465_v37  ;;  %v1880_v22 = vadd.f32 %v1659_v23, %v1472_v24 }
 0x274   :  { %1941 = vst.msk [vmem:[%s3990_s3 + $0xb0] sm:$0xff] %vm82_vm0, %v1873_v2  ;;  %1948 = vst.msk [vmem:[%s3990_s3 + $0xe8] sm:$0xff] %vm82_vm0, %v1880_v22  ;;  %v4186_v2 = vld [vmem:[#allocation30_spill] sm:$0xff]  ;;  %v4187_v22 = vld [vmem:[#allocation55_spill] sm:$0xff] }
 0x275   :  { %v1634_v61 = vpop.permute.xlu1 %1633  ;;  %v1669_v28 = vpop.permute.xlu0 %1668 }
 0x276   :  { %v1875_v56 = vadd.f32 %v1634_v61, %v1467_v41  ;;  %v1882_v55 = vadd.f32 %v1669_v28, %v1474_v16  ;;  %v1479_v41 = vmul.f32 %v4187_v22, %v4186_v2  ;;  %v1486_v16 = vmul.f32 %v4189_v5, %v4188_v58  ;;  %v4210_v2 = vld [vmem:[#allocation42_spill] sm:$0xff]  ;;  %v4211_v22 = vld [vmem:[#allocation67_spill] sm:$0xff]  ;;  %v4213_v5 = vld [vmem:[#allocation68_spill] sm:$0xff] }
 0x277   :  { %v4212_v58 = vld [vmem:[#allocation6_spill] sm:$0xff] }
 0x278   :  { %1943 = vst.msk [vmem:[%s3990_s3 + $0xc0] sm:$0xff] %vm82_vm0, %v1875_v56  ;;  %1950 = vst.msk [vmem:[%s3990_s3 + $0xf8] sm:$0xff] %vm82_vm0, %v1882_v55 }
 0x279   :  { %v1644_v3 = vpop.permute.xlu1 %1643  ;;  %v1679_v57 = vpop.permute.xlu0 %1678 }
 0x27a   :  { %v1877_v43 = vadd.f32 %v1644_v3, %v1469_v45  ;;  %v1884_v13 = vadd.f32 %v1679_v57, %v1476_v6  ;;  %v1481_v45 = vmul.f32 %v4191_v9, %v4190_v36  ;;  %v1488_v6 = vmul.f32 %v4193_v30, %v4192_v52  ;;  %v4214_v36 = vld [vmem:[#allocation3_spill] sm:$0xff]  ;;  %v4215_v9 = vld [vmem:[#allocation69_spill] sm:$0xff]  ;;  %v4216_v52 = vld [vmem:[#allocation8_spill] sm:$0xff] }
 0x27b   :  { %v4217_v30 = vld [vmem:[#allocation70_spill] sm:$0xff] }
 0x27c   :  { %1945 = vst.msk [vmem:[%s3990_s3 + $0xd0] sm:$0xff] %vm82_vm0, %v1877_v43  ;;  %1952 = vst.msk [vmem:[%s3990_s3 + $0x108] sm:$0xff] %vm82_vm0, %v1884_v13 }
 0x27d   :  { %v1654_v38 = vpop.permute.xlu1 %1653  ;;  %v1689_v7 = vpop.permute.xlu0 %1688 }
 0x27e   :  { %v1879_v20 = vadd.f32 %v1654_v38, %v1471_v18  ;;  %v1886_v39 = vadd.f32 %v1689_v7, %v1478_v17  ;;  %v1483_v18 = vmul.f32 %v4195_v51, %v4194_v46  ;;  %v1490_v17 = vmul.f32 %v4197_v54, %v4196_v53  ;;  %v4218_v46 = vld [vmem:[#allocation5_spill] sm:$0xff]  ;;  %v4219_v51 = vld [vmem:[#allocation71_spill] sm:$0xff]  ;;  %v4220_v53 = vld [vmem:[#allocation10_spill] sm:$0xff] }
 0x27f   :  { %v4221_v54 = vld [vmem:[#allocation72_spill] sm:$0xff] }
 0x280   :  { %1947 = vst.msk [vmem:[%s3990_s3 + $0xe0] sm:$0xff] %vm82_vm0, %v1879_v20  ;;  %1954 = vst.msk [vmem:[%s3990_s3 + $0x118] sm:$0xff] %vm82_vm0, %v1886_v39 }
 0x281   :  { %v1664_v27 = vpop.permute.xlu1 %1663  ;;  %v1699_v14 = vpop.permute.xlu0 %1698 }
 0x282   :  { %v1881_v25 = vadd.f32 %v1664_v27, %v1473_v33  ;;  %v1888_v62 = vadd.f32 %v1699_v14, %v1480_v26  ;;  %v1485_v33 = vmul.f32 %v4199_v21, %v4198_v15  ;;  %v1492_v26 = vmul.f32 %v4201_v42, %v4200_v60  ;;  %v4222_v15 = vld [vmem:[#allocation7_spill] sm:$0xff]  ;;  %v4223_v21 = vld [vmem:[#allocation73_spill] sm:$0xff]  ;;  %v4224_v60 = vld [vmem:[#allocation12_spill] sm:$0xff] }
 0x283   :  { %v4225_v42 = vld [vmem:[#allocation74_spill] sm:$0xff] }
 0x284   :  { %1949 = vst.msk [vmem:[%s3990_s3 + $0xf0] sm:$0xff] %vm82_vm0, %v1881_v25  ;;  %1956 = vst.msk [vmem:[%s3990_s3 + $0x128] sm:$0xff] %vm82_vm0, %v1888_v62 }
 0x285   :  { %v1674_v19 = vpop.permute.xlu1 %1673  ;;  %v1709_v0 = vpop.permute.xlu0 %1708 }
 0x286   :  { %v1883_v10 = vadd.f32 %v1674_v19, %v1475_v47  ;;  %v1890_v49 = vadd.f32 %v1709_v0, %v1482_v31  ;;  %v1487_v47 = vmul.f32 %v4203_v35, %v4202_v50  ;;  %v1494_v31 = vmul.f32 %v4205_v34, %v4204_v59  ;;  %v4226_v50 = vld [vmem:[#allocation9_spill] sm:$0xff]  ;;  %v4227_v35 = vld [vmem:[#allocation75_spill] sm:$0xff]  ;;  %v4228_v59 = vld [vmem:[#allocation14_spill] sm:$0xff] }
 0x287   :  { %v4229_v34 = vld [vmem:[#allocation76_spill] sm:$0xff] }
 0x288   :  { %1951 = vst.msk [vmem:[%s3990_s3 + $0x100] sm:$0xff] %vm82_vm0, %v1883_v10  ;;  %1958 = vst.msk [vmem:[%s3990_s3 + $0x138] sm:$0xff] %vm82_vm0, %v1890_v49 }
 0x289   :  { %v1684_v37 = vpop.permute.xlu1 %1683  ;;  %v1719_v24 = vpop.permute.xlu0 %1718 }
 0x28a   :  { %v1885_v4 = vadd.f32 %v1684_v37, %v1477_v11  ;;  %v1892_v23 = vadd.f32 %v1719_v24, %v1484_v29  ;;  %v1489_v11 = vmul.f32 %v4207_v32, %v4206_v8  ;;  %v1496_v29 = vmul.f32 %v4209_v40, %v4208_v12  ;;  %v4230_v8 = vld [vmem:[#allocation11_spill] sm:$0xff]  ;;  %v4231_v32 = vld [vmem:[#allocation77_spill] sm:$0xff]  ;;  %v4232_v12 = vld [vmem:[#allocation16_spill] sm:$0xff] }
 0x28b   :  { %v4233_v40 = vld [vmem:[#allocation78_spill] sm:$0xff] }
 0x28c   :  { %1953 = vst.msk [vmem:[%s3990_s3 + $0x110] sm:$0xff] %vm82_vm0, %v1885_v4  ;;  %1960 = vst.msk [vmem:[%s3990_s3 + $0x148] sm:$0xff] %vm82_vm0, %v1892_v23 }
 0x28d   :  { %v1694_v61 = vpop.permute.xlu1 %1693  ;;  %v1729_v28 = vpop.permute.xlu0 %1728 }
 0x28e   :  { %v1887_v56 = vadd.f32 %v1694_v61, %v1479_v41  ;;  %v1894_v55 = vadd.f32 %v1729_v28, %v1486_v16  ;;  %v1491_v41 = vmul.f32 %v4211_v22, %v4210_v2  ;;  %v1498_v16 = vmul.f32 %v4213_v5, %v4212_v58  ;;  %v4234_v2 = vld [vmem:[#allocation13_spill] sm:$0xff]  ;;  %v4236_v58 = vld [vmem:[#allocation79_spill] sm:$0xff] }
 0x28f   :  { %v1503_v22 = vmul.f32 %v3542_v44, %v4234_v2 }
 0x290   :  { %1955 = vst.msk [vmem:[%s3990_s3 + $0x120] sm:$0xff] %vm82_vm0, %v1887_v56  ;;  %1962 = vst.msk [vmem:[%s3990_s3 + $0x158] sm:$0xff] %vm82_vm0, %v1894_v55 }
 0x291   :  { %v1704_v3 = vpop.permute.xlu1 %1703  ;;  %v1739_v57 = vpop.permute.xlu0 %1738 }
 0x292   :  { %v1889_v43 = vadd.f32 %v1704_v3, %v1481_v45  ;;  %v1896_v13 = vadd.f32 %v1739_v57, %v1488_v6  ;;  %v1493_v45 = vmul.f32 %v4215_v9, %v4214_v36  ;;  %v1500_v6 = vmul.f32 %v4217_v30, %v4216_v52 }
 0x294   :  { %1957 = vst.msk [vmem:[%s3990_s3 + $0x130] sm:$0xff] %vm82_vm0, %v1889_v43  ;;  %1964 = vst.msk [vmem:[%s3990_s3 + $0x168] sm:$0xff] %vm82_vm0, %v1896_v13 }
 0x295   :  { %v1714_v38 = vpop.permute.xlu1 %1713  ;;  %v1749_v7 = vpop.permute.xlu0 %1748 }
 0x296   :  { %v1891_v20 = vadd.f32 %v1714_v38, %v1483_v18  ;;  %v1898_v39 = vadd.f32 %v1749_v7, %v1490_v17  ;;  %v1495_v18 = vmul.f32 %v4219_v51, %v4218_v46  ;;  %v1502_v17 = vmul.f32 %v4221_v54, %v4220_v53 }
 0x298   :  { %1959 = vst.msk [vmem:[%s3990_s3 + $0x140] sm:$0xff] %vm82_vm0, %v1891_v20  ;;  %1966 = vst.msk [vmem:[%s3990_s3 + $0x178] sm:$0xff] %vm82_vm0, %v1898_v39 }
 0x299   :  { %v1724_v27 = vpop.permute.xlu1 %1723  ;;  %v1759_v14 = vpop.permute.xlu0 %1758 }
 0x29a   :  { %v1893_v25 = vadd.f32 %v1724_v27, %v1485_v33  ;;  %v1900_v62 = vadd.f32 %v1759_v14, %v1492_v26  ;;  %v1497_v33 = vmul.f32 %v4223_v21, %v4222_v15  ;;  %v1504_v26 = vmul.f32 %v4225_v42, %v4224_v60 }
 0x29c   :  { %1961 = vst.msk [vmem:[%s3990_s3 + $0x150] sm:$0xff] %vm82_vm0, %v1893_v25  ;;  %1968 = vst.msk [vmem:[%s3990_s3 + $0x188] sm:$0xff] %vm82_vm0, %v1900_v62 }
 0x29d   :  { %v1734_v19 = vpop.permute.xlu1 %1733  ;;  %v1769_v0 = vpop.permute.xlu0 %1768 }
 0x29e   :  { %v1895_v10 = vadd.f32 %v1734_v19, %v1487_v47  ;;  %v1902_v49 = vadd.f32 %v1769_v0, %v1494_v31  ;;  %v1499_v47 = vmul.f32 %v4227_v35, %v4226_v50  ;;  %v1506_v31 = vmul.f32 %v4229_v34, %v4228_v59 }
 0x2a0   :  { %1963 = vst.msk [vmem:[%s3990_s3 + $0x160] sm:$0xff] %vm82_vm0, %v1895_v10  ;;  %1970 = vst.msk [vmem:[%s3990_s3 + $0x198] sm:$0xff] %vm82_vm0, %v1902_v49 }
 0x2a1   :  { %v1744_v37 = vpop.permute.xlu1 %1743  ;;  %v1779_v24 = vpop.permute.xlu0 %1778 }
 0x2a2   :  { %v1897_v4 = vadd.f32 %v1744_v37, %v1489_v11  ;;  %v1904_v23 = vadd.f32 %v1779_v24, %v1496_v29  ;;  %v1501_v11 = vmul.f32 %v4231_v32, %v4230_v8  ;;  %v1508_v29 = vmul.f32 %v4233_v40, %v4232_v12 }
 0x2a4   :  { %1965 = vst.msk [vmem:[%s3990_s3 + $0x170] sm:$0xff] %vm82_vm0, %v1897_v4  ;;  %1972 = vst.msk [vmem:[%s3990_s3 + $0x1a8] sm:$0xff] %vm82_vm0, %v1904_v23 }
 0x2a5   :  { %v1754_v61 = vpop.permute.xlu1 %1753  ;;  %v1789_v28 = vpop.permute.xlu0 %1788 }
 0x2a6   :  { %v1899_v56 = vadd.f32 %v1754_v61, %v1491_v41  ;;  %v1906_v55 = vadd.f32 %v1789_v28, %v1498_v16  ;;  %v4235_v41 = vld [vmem:[#allocation18_spill] sm:$0xff] }
 0x2a7   :  { %v1510_v5 = vmul.f32 %v4236_v58, %v4235_v41 }
 0x2a8   :  { %1967 = vst.msk [vmem:[%s3990_s3 + $0x180] sm:$0xff] %vm82_vm0, %v1899_v56  ;;  %1974 = vst.msk [vmem:[%s3990_s3 + $0x1b8] sm:$0xff] %vm82_vm0, %v1906_v55  ;;  %v4237_v55 = vld [vmem:[#allocation15_spill] sm:$0xff] }
 0x2a9   :  { %v1764_v3 = vpop.permute.xlu1 %1763  ;;  %v1799_v57 = vpop.permute.xlu0 %1798  ;;  %v1505_v44 = vmul.f32 %v3554_v48, %v4237_v55 }
 0x2aa   :  { %v1901_v43 = vadd.f32 %v1764_v3, %v1493_v45  ;;  %v1908_v13 = vadd.f32 %v1799_v57, %v1500_v6  ;;  %v4238_v45 = vld [vmem:[#allocation17_spill] sm:$0xff]  ;;  %v4239_v6 = vld [vmem:[#allocation43_spill] sm:$0xff] }
 0x2ab   :  { %v1507_v52 = vmul.f32 %v3568_v63, %v4238_v45  ;;  %v1509_v3 = vmul.f32 %v3582_v1, %v4239_v6 }
 0x2ac   :  { %1969 = vst.msk [vmem:[%s3990_s3 + $0x190] sm:$0xff] %vm82_vm0, %v1901_v43  ;;  %1976 = vst.msk [vmem:[%s3990_s3 + $0x1c8] sm:$0xff] %vm82_vm0, %v1908_v13 }
 0x2ad   :  { %v1774_v38 = vpop.permute.xlu1 %1773  ;;  %v1809_v7 = vpop.permute.xlu0 %1808 }
 0x2ae   :  { %v1903_v20 = vadd.f32 %v1774_v38, %v1495_v18  ;;  %v1910_v39 = vadd.f32 %v1809_v7, %v1502_v17 }
 0x2b0   :  { %1971 = vst.msk [vmem:[%s3990_s3 + $0x1a0] sm:$0xff] %vm82_vm0, %v1903_v20  ;;  %1978 = vst.msk [vmem:[%s3990_s3 + $0x1d8] sm:$0xff] %vm82_vm0, %v1910_v39 }
 0x2b1   :  { %v1784_v27 = vpop.permute.xlu1 %1783  ;;  %v1819_v14 = vpop.permute.xlu0 %1818 }
 0x2b2   :  { %v1905_v25 = vadd.f32 %v1784_v27, %v1497_v33  ;;  %v1912_v62 = vadd.f32 %v1819_v14, %v1504_v26 }
 0x2b4   :  { %1973 = vst.msk [vmem:[%s3990_s3 + $0x1b0] sm:$0xff] %vm82_vm0, %v1905_v25  ;;  %1980 = vst.msk [vmem:[%s3990_s3 + $0x1e8] sm:$0xff] %vm82_vm0, %v1912_v62 }
 0x2b5   :  { %v1794_v19 = vpop.permute.xlu1 %1793  ;;  %v1829_v0 = vpop.permute.xlu0 %1828 }
 0x2b6   :  { %v1907_v10 = vadd.f32 %v1794_v19, %v1499_v47  ;;  %v1914_v49 = vadd.f32 %v1829_v0, %v1506_v31 }
 0x2b8   :  { %1975 = vst.msk [vmem:[%s3990_s3 + $0x1c0] sm:$0xff] %vm82_vm0, %v1907_v10  ;;  %1982 = vst.msk [vmem:[%s3990_s3 + $0x1f8] sm:$0xff] %vm82_vm0, %v1914_v49 }
 0x2b9   :  { %v1804_v37 = vpop.permute.xlu1 %1803  ;;  %v1839_v24 = vpop.permute.xlu0 %1838 }
 0x2ba   :  { %v1909_v4 = vadd.f32 %v1804_v37, %v1501_v11  ;;  %v1916_v23 = vadd.f32 %v1839_v24, %v1508_v29 }
 0x2bc   :  { %1977 = vst.msk [vmem:[%s3990_s3 + $0x1d0] sm:$0xff] %vm82_vm0, %v1909_v4  ;;  %1984 = vst.msk [vmem:[%s3990_s3 + $0x208] sm:$0xff] %vm82_vm0, %v1916_v23 }
 0x2bd   :  { %v1814_v16 = vpop.permute.xlu1 %1813  ;;  %v1849_v61 = vpop.permute.xlu0 %1848 }
 0x2be   :  { %v1911_v28 = vadd.f32 %v1814_v16, %v1503_v22  ;;  %v1918_v56 = vadd.f32 %v1849_v61, %v1510_v5 }
 0x2c0   :  { %1979 = vst.msk [vmem:[%s3990_s3 + $0x1e0] sm:$0xff] %vm82_vm0, %v1911_v28  ;;  %1986 = vst.msk [vmem:[%s3990_s3 + $0x218] sm:$0xff] %vm82_vm0, %v1918_v56 }
 0x2c1   :  { %v1824_v36 = vpop.permute.xlu1 %1823 }
 0x2c2   :  { %v1913_v9 = vadd.f32 %v1824_v36, %v1505_v44 }
 0x2c4   :  { %1981 = vst.msk [vmem:[%s3990_s3 + $0x1f0] sm:$0xff] %vm82_vm0, %v1913_v9 }
 0x2c5   :  { %v1834_v48 = vpop.permute.xlu1 %1833 }
 0x2c6   :  { %v1915_v30 = vadd.f32 %v1834_v48, %v1507_v52 }
 0x2c8   :  { %1983 = vst.msk [vmem:[%s3990_s3 + $0x200] sm:$0xff] %vm82_vm0, %v1915_v30 }
 0x2c9   :  { %v1844_v57 = vpop.permute.xlu1 %1843 }
 0x2ca   :  { %v1917_v43 = vadd.f32 %v1844_v57, %v1509_v3 }
 0x2cc   :  { %1985 = vst.msk [vmem:[%s3990_s3 + $0x210] sm:$0xff] %vm82_vm0, %v1917_v43 }

</bundles_post_ra>
